<compile_context>
chip_gen: v6e
topology: v6e:2x2x1
jax: 0.10.0
libtpu: 0.0.40
codegen_flags: <defaults>
</compile_context>

<pallas_src>
import jax
import jax.numpy as jnp
from jax.experimental import pallas as pl
from jax.experimental.pallas import tpu as pltpu


def _relu_conv1x1_kernel(x_ref, w_ref, o_ref):
    # x_ref: (1, C_in, HW) f32   -- resident across the C_out-tile grid axis
    # w_ref: (tn, C_in)    bf16  -- streamed, one C_out tile per grid step
    # o_ref: (1, tn, HW)   f32
    x = jnp.maximum(x_ref[0], jnp.zeros((), x_ref.dtype))       # ReLU (VPU)
    x = x.astype(w_ref.dtype)                                   # bf16 MXU feed
    o_ref[0] = jnp.dot(
        w_ref[...], x, preferred_element_type=jnp.float32       # MXU, f32 acc
    ).astype(o_ref.dtype)


def _pick_cout_tile(c_out: int, max_tile: int = 256) -> int:
    """Largest divisor of c_out that is a multiple of 8 and <= max_tile.

    Falls back to the full extent (always a legal block dim) if none exists.
    """
    best = c_out
    for t in range(8, min(max_tile, c_out) + 1, 8):
        if c_out % t == 0:
            best = t
    return best


def relu_conv1x1(x_nchw: jax.Array, weight_oi: jax.Array) -> jax.Array:
    """ReLU followed by a 1x1 conv (no bias), PyTorch NCHW semantics.

    x_nchw:    (N, C_in, H, W)  float32
    weight_oi: (C_out, C_in)    float32 or bfloat16 (Conv2d weight, 1x1 dims squeezed)
    returns:   (N, C_out, H, W) float32
    """
    N, C_in, H, W = x_nchw.shape
    C_out, c_in_w = weight_oi.shape
    assert c_in_w == C_in
    HW = H * W

    x_mat = x_nchw.reshape(N, C_in, HW)          # copy-free for NCHW layout
    tn = _pick_cout_tile(C_out)                  # 168 for C_out=1008 -> 6 tiles
    grid = (N, C_out // tn)

    out_mat = pl.pallas_call(
        _relu_conv1x1_kernel,
        out_shape=jax.ShapeDtypeStruct((N, C_out, HW), x_nchw.dtype),
        grid_spec=pl.GridSpec(
            grid=grid,
            in_specs=[
                # x block: same block index across the j axis => stays VMEM-resident.
                pl.BlockSpec((1, C_in, HW), lambda n, j: (n, 0, 0)),
                # weight: streamed tile-by-tile in its native (C_out, C_in) layout.
                pl.BlockSpec((tn, C_in), lambda n, j: (j, 0)),
            ],
            out_specs=pl.BlockSpec((1, tn, HW), lambda n, j: (n, j, 0)),
        ),
        compiler_params=pltpu.CompilerParams(
            # Every (n, j) tile is independent: let megacore (v7x) shard them.
            dimension_semantics=("parallel", "parallel"),
        ),
    )(x_mat, weight_oi)

    return out_mat.reshape(N, C_out, H, W)       # copy-free


if __name__ == "__main__":
    # Shapes implied by the module: x246 = randn([1, 1008, 7, 7]),
    # Conv2d(1008, 1008, kernel_size=1, bias=False).
    N, C, H, W = 1, 1008, 7, 7

    key = jax.random.PRNGKey(0)
    kx, kw = jax.random.split(key)
    x = jax.random.normal(kx, (N, C, H, W), dtype=jnp.float32)
    # Deterministic Conv2d-style init (kaiming-uniform-ish scale for fan_in=1008).
    bound = 1.0 / jnp.sqrt(jnp.float32(C))
    weight_f32 = jax.random.uniform(
        kw, (C, C), dtype=jnp.float32, minval=-bound, maxval=bound
    )
    # One-time, hoisted parameter-setup cast (perf-review item): the weight is
    # stored and streamed as bf16; activations and accumulation stay f32.
    weight_bf16 = weight_f32.astype(jnp.bfloat16)

    out = relu_conv1x1(x, weight_bf16)
    out = jax.block_until_ready(out)
    assert out.shape == (N, C, H, W)

    x_relu = jnp.maximum(x, 0.0)

    # Tight check: reference using the same bf16 weight/activation feed
    # (validates the kernel plumbing itself).
    ref_bf16 = jnp.einsum(
        "oc,nchw->nohw",
        weight_bf16.astype(jnp.float32),
        x_relu.astype(jnp.bfloat16).astype(jnp.float32),
    )
    assert jnp.allclose(out, ref_bf16, atol=1e-2, rtol=1e-2)

    # Loose check: full-f32 PyTorch-equivalent reference (confirms the bf16
    # weight storage stays within a small quantization error).
    ref_f32 = jnp.einsum("oc,nchw->nohw", weight_f32, x_relu)
    assert jnp.allclose(out, ref_f32, atol=5e-2, rtol=5e-2)

    print("KERNEL_OK")
</pallas_src>

<mosaic_0001>
module attributes {stable_mosaic.version = 11 : i64} {
  func.func @_relu_conv1x1_kernel(%arg0: i32, %arg1: i32, %arg2: memref<1x1008x49xf32, #tpu.memory_space<vmem>>, %arg3: memref<168x1008xbf16, #tpu.memory_space<vmem>>, %arg4: memref<1x168x49xf32, #tpu.memory_space<vmem>>) attributes {dimension_semantics = [#tpu.dimension_semantics<parallel>, #tpu.dimension_semantics<parallel>], iteration_bounds = array<i64: 1, 6>, scalar_prefetch = 0 : i64, scratch_operands = 0 : i64, tpu.core_type = #tpu.core_type<tc>, window_params = [{transform_indices = @transform_0, window_bounds = array<i64: 1, 1008, 49>}, {transform_indices = @transform_1, window_bounds = array<i64: 168, 1008>}, {transform_indices = @transform_2, window_bounds = array<i64: 1, 168, 49>}]} {
    %c0 = arith.constant 0 : index
    %c0_0 = arith.constant 0 : index
    %c0_1 = arith.constant 0 : index
    %0 = vector.load %arg2[%c0, %c0_0, %c0_1] : memref<1x1008x49xf32, #tpu.memory_space<vmem>>, vector<1x1008x49xf32>
    %1 = vector.shape_cast %0 : vector<1x1008x49xf32> to vector<1008x49xf32>
    %cst = arith.constant 0.000000e+00 : f32
    %2 = vector.broadcast %cst : f32 to vector<1008x49xf32>
    %3 = arith.maximumf %1, %2 : vector<1008x49xf32>
    %4 = arith.truncf %3 : vector<1008x49xf32> to vector<1008x49xbf16>
    %c0_2 = arith.constant 0 : index
    %c0_3 = arith.constant 0 : index
    %5 = vector.load %arg3[%c0_2, %c0_3] : memref<168x1008xbf16, #tpu.memory_space<vmem>>, vector<168x1008xbf16>
    %cst_4 = arith.constant dense<0.000000e+00> : vector<168x49xf32>
    %6 = tpu.matmul %5, %4, %cst_4 {dimension_numbers = #tpu.dot_dimension_numbers<[1], [0], [0], [1], [0, 0, 1, 1], [], []>} : vector<168x1008xbf16>, vector<1008x49xbf16>, vector<168x49xf32> -> vector<168x49xf32>
    %c0_5 = arith.constant 0 : index
    %c0_6 = arith.constant 0 : index
    %c0_7 = arith.constant 0 : index
    %7 = vector.load %arg4[%c0_5, %c0_6, %c0_7] : memref<1x168x49xf32, #tpu.memory_space<vmem>>, vector<1x168x49xf32>
    %8 = vector.shape_cast %7 : vector<1x168x49xf32> to vector<168x49xf32>
    %9 = vector.shape_cast %6 : vector<168x49xf32> to vector<1x168x49xf32>
    tpu.vector_store %arg4[%c0_5, %c0_6, %c0_7], %9 {strides = array<i32>} : memref<1x168x49xf32, #tpu.memory_space<vmem>>, vector<1x168x49xf32>,
    return
  }
  func.func @transform_0(%arg0: i32, %arg1: i32) -> (i32, i32, i32) {
    %c0_i32 = arith.constant 0 : i32
    %c0_i32_0 = arith.constant 0 : i32
    %c0_i32_1 = arith.constant 0 : i32
    return %arg0, %c0_i32, %c0_i32_0 : i32, i32, i32
  }
  func.func @transform_1(%arg0: i32, %arg1: i32) -> (i32, i32) {
    %c0_i32 = arith.constant 0 : i32
    %c0_i32_0 = arith.constant 0 : i32
    return %arg1, %c0_i32 : i32, i32
  }
  func.func @transform_2(%arg0: i32, %arg1: i32) -> (i32, i32, i32) {
    %c0_i32 = arith.constant 0 : i32
    %c0_i32_0 = arith.constant 0 : i32
    return %arg0, %arg1, %c0_i32 : i32, i32, i32
  }
}

</mosaic_0001>

<bundles_post_ra>
// kernel: tpu_custom_call.1
= control target key start
LH: loop header
LB: loop body
LE: loop exit
PB: predicated region body
PF: predicated region fallthrough
CT: control target
= control target key end

     0   :  { %7 = vsyncpa [#allocation3], 0  ;;  %s2957_s0 = inlined_call_operand.vmem [shape: f32[1,1008,49], index: 0, kind: input, shape index: {}]   ;;  %s2958_s1 = inlined_call_operand.hbm [shape: bf16[1008,1008], index: 1, kind: input, shape index: {}]   ;;  %s2959_s2 = inlined_call_operand.vmem [shape: f32[1,1008,49], index: 2, kind: output, shape index: {}]  }
   0x1   :  { %9 = vsyncpa [#allocation3 + $0x1], 0  ;;  %s2195_s9 = smov 0   ;;  %s2197_s10 = smov 0  }
   0x2   :  { %s2199_s11 = smov 0   ;;  %s2201_s12 = smov 0  }
   0x3   :  { %s2203_s13 = smov 0   ;;  %s2205_s14 = smov 0  }
   0x4 LB: > { %s1669_s15 = sadd.s32 4294967295, %s2174_s14   ;;  %s24_s16 = sadd.s32 1, %s2170_s13  ;;  %s2174_s14 = sphi %s2205_s14, %s15_s14   ;;  %s2170_s13 = sphi %s2203_s13, %s2966_s13   ;;  %s2166_s12 = sphi %s2201_s12, %s2965_s12   ;;  %s2162_s11 = sphi %s2199_s11, %s2964_s11   ;;  %s2158_s10 = sphi %s2197_s10, %s2963_s10   ;;  %s2154_s9 = sphi %s2195_s9, %s2962_s9  }
   0x5   : > { %p25_p0 = scmp.ge.s32.totalorder %s24_s16, 6  ;;  %s60_s17 = sadd.s32 1, %s2162_s11 }
   0x6   : > { %p67_p1 = scmp.ne.s32.totalorder %s2162_s11, %s2158_s10  ;;  %p68_p2 = scmp.eq.s32.totalorder %s2174_s14, 0 }
   0x7   : > { %s2968_s16 = smov (%p25_p0, %s24_s16), 0  ;;  %p73_p4 = scmp.ne.s32.totalorder %s2158_s10, %s2154_s9 }
   0x8   : > { %p69_p3 = por %p68_p2, %p67_p1  ;;  %s57_s18 = ssub.s32 %s2170_s13, %s2968_s16 }
   0x9   : > { %p74_p5 = scmp.eq.s32.totalorder %s1669_s15, 0  ;;  %p58_p6 = scmp.eq.s32.totalorder %s57_s18, 0 }
   0xa   : > { %p2036_p8 = scmp.lt.s32.totalorder %s2174_s14, 6  ;;  %s133_s21 = sand.u32 1, %s2162_s11  }
   0xb   : > { %p2234_p7 = por %p74_p5, %p73_p4  ;;  %s1781_s22 = smul.u32 10752, %s2170_s13 }
   0xc   : > { %s2240_s20 = scalar_select %p58_p6, %s2162_s11, %s60_s17  }
   0xd   : > { %s2028_s23 = smul.u32 672, %s133_s21  ;;  %s144_s26 = scalar_lea.hbm %s2958_s1, %s1781_s22 }
   0xe   : > { %p2247_p9 = pnand %p2036_p8, %p69_p3  ;;  %s134_s30 = scalar_lea.sflag [#allocation3], %s133_s21 }
   0xf   : > { %s137_s28 = scalar_lea.vmem [#allocation2], %s2028_s23  ;;  %s2176_s4 = smov [#allocation2]  }
  0x10   : > { %s145_s29 = sshll.u32 %s137_s28, 4  ;;  %p2098_p10 = pneg %p2247_p9  ;;  %s146_s29 = int_to_ptr.vmem [resolvable:$true] %s145_s29 }
  0x11   : > { %s2109_s3 = scalar_lea.vmem %s146_s29, 10752  ;;  %s2114_s5 = sshll.u32 %s2176_s4, 4  ;;  %s2115_s5 = int_to_ptr.vmem [resolvable:$false] %s2114_s5 }
  0x12   : > { %p2110_p11 = scmp.ne.s32.totalorder %s146_s29, %s2109_s3  ;;  %s2116_s6 = scalar_lea.vmem %s2115_s5, 21504 }
  0x13   : > { %p2117_p0 = scmp.lt.s32.totalorder %s146_s29, %s2115_s5  ;;  %p2118_p1 = scmp.lt.s32.totalorder %s2116_s6, %s2109_s3 }
  0x14   : > { %p2112_p12 = pnand %p2110_p11, %p2098_p10 }
  0x15   : > { %p2119_p2 = por %p2118_p1, %p2117_p0 }
  0x16   : > { %p2113_p13 = pneg %p2112_p12 }
  0x18   : > { %p2120_p3 = pnand %p2119_p2, %p2113_p13 }
  0x1a   : > { %2123 = shalt.err (!%p2120_p3)
}
  0x1b   : > { %s2177_s7 = smov 512   ;;  %s2178_s8 = smov 32  }
  0x1c   : > { %2035 = dma.hbm_to_vmem [thread:$0]  (!%p2247_p9), %s144_s26, 10752, %s146_s29, %s134_s30, %s2177_s7, %s2177_s7, %s2178_s8  }
  0x1d   : > { %p1676_p4 = scmp.ge.s32.totalorder %s2174_s14, 1  ;;  %p153_p5 = scmp.lt.s32.totalorder %s2174_s14, 7 }
  0x1f   : > { %p154_p6 = pnand %p1676_p4, %p153_p5 }
  0x20   : > { %s159_s9 = sand.u32 (!%p154_p6), 1, %s2158_s10  }
  0x21   : > { %157 = sbr.rel (%p154_p6) target bundleno = 447 (0x1bf), region = 28  ;;  %s160_s17 = scalar_lea.sflag (!%p154_p6), [#allocation3], %s159_s9 }
  0x22   : > { %s2029_s15 = smul.u32 (!%p154_p6), 672, %s159_s9 }
  0x24   : > { %s2258_s18 = scalar_lea.vmem (!%p154_p6), [#allocation2], %s2029_s15 }
  0x26   : > { %2149 = dma.done.wait (%p2234_p7), %s160_s17, 10752  }
  0x27   : > { %2151 = vsyncadd (%p2234_p7), %s160_s17, 4294956544  ;;  %v240_v0 = vld [vmem:[%s2957_s0 + $0xf0] sm:$0xff]  ;;  %v241_v1 = vld [vmem:[%s2957_s0 + $0xf8] sm:$0xff]  ;;  %vm1026_vm0 = vcmask 916480   ;;  %vm1540_vm1 = vcmask 400384  }
  0x28   : > { %v272_v2 = vld [vmem:[%s2957_s0 + $0x1f0] sm:$0xff]  ;;  %v366_v3 = vmax.f32 %v240_v0, 0.0  ;;  %v367_v4 = vmax.f32 %v241_v1, 0.0  ;;  %v273_v5 = vld [vmem:[%s2957_s0 + $0x1f8] sm:$0xff]  ;;  %v238_v14 = vld [vmem:[%s2957_s0 + $0xe0] sm:$0xff] }
  0x29   : > { %v398_v6 = vmax.f32 %v272_v2, 0.0  ;;  %v224_v7 = vld [vmem:[%s2957_s0 + $0x70] sm:$0xff]  ;;  %v225_v8 = vld [vmem:[%s2957_s0 + $0x78] sm:$0xff]  ;;  %v399_v9 = vmax.f32 %v273_v5, 0.0  ;;  %v239_v18 = vld [vmem:[%s2957_s0 + $0xe8] sm:$0xff]  ;;  %v364_v19 = vmax.f32 %v238_v14, 0.0 }
  0x2a   : > { %v350_v10 = vmax.f32 %v224_v7, 0.0  ;;  %v351_v11 = vmax.f32 %v225_v8, 0.0  ;;  %v256_v12 = vld [vmem:[%s2957_s0 + $0x170] sm:$0xff]  ;;  %v257_v13 = vld [vmem:[%s2957_s0 + $0x178] sm:$0xff]  ;;  %v477_v15 = vpack.c.bf16 %v367_v4, %v366_v3  ;;  %v270_v20 = vld [vmem:[%s2957_s0 + $0x1e0] sm:$0xff]  ;;  %v365_v24 = vmax.f32 %v239_v18, 0.0 }
  0x2b   : > { %v382_v16 = vmax.f32 %v256_v12, 0.0  ;;  %v383_v17 = vmax.f32 %v257_v13, 0.0  ;;  %v271_v21 = vld [vmem:[%s2957_s0 + $0x1e8] sm:$0xff]  ;;  %v493_v22 = vpack.c.bf16 %v399_v9, %v398_v6  ;;  %v396_v25 = vmax.f32 %v270_v20, 0.0  ;;  %v222_v26 = vld [vmem:[%s2957_s0 + $0x60] sm:$0xff]  ;;  %v236_v34 = vld [vmem:[%s2957_s0 + $0xd0] sm:$0xff] }
  0x2c   : > { %v469_v23 = vpack.c.bf16 %v351_v11, %v350_v10  ;;  %v223_v27 = vld [vmem:[%s2957_s0 + $0x68] sm:$0xff]  ;;  %v254_v28 = vld [vmem:[%s2957_s0 + $0x160] sm:$0xff]  ;;  %1782 = vmatprep.subr.bf16.mxu0 %v477_v15  ;;  %v397_v30 = vmax.f32 %v271_v21, 0.0  ;;  %v348_v31 = vmax.f32 %v222_v26, 0.0  ;;  %v237_v35 = vld [vmem:[%s2957_s0 + $0xd8] sm:$0xff]  ;;  %v476_v36 = vpack.c.bf16 %v365_v24, %v364_v19 }
  0x2d   : > { %v485_v29 = vpack.c.bf16 %v383_v17, %v382_v16  ;;  %v349_v32 = vmax.f32 %v223_v27, 0.0  ;;  %v255_v33 = vld [vmem:[%s2957_s0 + $0x168] sm:$0xff]  ;;  %1864 = vmatprep.subr.bf16.mxu1 %v493_v22  ;;  %v380_v37 = vmax.f32 %v254_v28, 0.0  ;;  %v362_v39 = vmax.f32 %v236_v34, 0.0  ;;  %v268_v40 = vld [vmem:[%s2957_s0 + $0x1d0] sm:$0xff]  ;;  %v269_v41 = vld [vmem:[%s2957_s0 + $0x1d8] sm:$0xff] }
  0x2e   : > { %1783 = vmatpush3.bf16.msra.mxu0 %v469_v23  ;;  %v381_v38 = vmax.f32 %v255_v33, 0.0  ;;  %v220_v42 = vld [vmem:[%s2957_s0 + $0x50] sm:$0xff]  ;;  %v492_v43 = vpack.c.bf16 %v397_v30, %v396_v25  ;;  %v363_v45 = vmax.f32 %v237_v35, 0.0  ;;  %v394_v46 = vmax.f32 %v268_v40, 0.0  ;;  %v221_v47 = vld [vmem:[%s2957_s0 + $0x58] sm:$0xff]  ;;  %v234_v54 = vld [vmem:[%s2957_s0 + $0xc0] sm:$0xff] }
  0x2f   : > { %1865 = vmatpush3.bf16.msra.mxu1 %v485_v29  ;;  %v468_v44 = vpack.c.bf16 %v349_v32, %v348_v31  ;;  %v252_v48 = vld [vmem:[%s2957_s0 + $0x150] sm:$0xff]  ;;  %v253_v49 = vld [vmem:[%s2957_s0 + $0x158] sm:$0xff]  ;;  %1784 = vmatprep.subr.bf16.mxu0 %v476_v36  ;;  %v395_v51 = vmax.f32 %v269_v41, 0.0  ;;  %v346_v52 = vmax.f32 %v220_v42, 0.0  ;;  %v347_v53 = vmax.f32 %v221_v47, 0.0  ;;  %v235_v55 = vld [vmem:[%s2957_s0 + $0xc8] sm:$0xff] }
  0x30   : > { %v484_v50 = vpack.c.bf16 %v381_v38, %v380_v37  ;;  %v266_v56 = vld [vmem:[%s2957_s0 + $0x1c0] sm:$0xff]  ;;  %1866 = vmatprep.subr.bf16.mxu1 %v492_v43  ;;  %v475_v57 = vpack.c.bf16 %v363_v45, %v362_v39  ;;  %v378_v58 = vmax.f32 %v252_v48, 0.0  ;;  %v379_v59 = vmax.f32 %v253_v49, 0.0  ;;  %v267_v61 = vld [vmem:[%s2957_s0 + $0x1c8] sm:$0xff]  ;;  %v232_v6 = vld [vmem:[%s2957_s0 + $0xb0] sm:$0xff] }
  0x31   : > { %v360_v60 = vmax.f32 %v234_v54, 0.0  ;;  %v218_v62 = vld [vmem:[%s2957_s0 + $0x40] sm:$0xff]  ;;  %v219_v63 = vld [vmem:[%s2957_s0 + $0x48] sm:$0xff]  ;;  %v491_v0 = vpack.c.bf16 %v395_v51, %v394_v46  ;;  %v467_v1 = vpack.c.bf16 %v347_v53, %v346_v52  ;;  %v361_v2 = vmax.f32 %v235_v55, 0.0  ;;  %v233_v11 = vld [vmem:[%s2957_s0 + $0xb8] sm:$0xff] }
  0x32   : > { %1785 = vmatpush3.bf16.msra.mxu0 %v468_v44  ;;  %v392_v3 = vmax.f32 %v266_v56, 0.0  ;;  %v250_v4 = vld [vmem:[%s2957_s0 + $0x140] sm:$0xff]  ;;  %v251_v5 = vld [vmem:[%s2957_s0 + $0x148] sm:$0xff]  ;;  %v483_v7 = vpack.c.bf16 %v379_v59, %v378_v58  ;;  %v393_v8 = vmax.f32 %v267_v61, 0.0  ;;  %v344_v9 = vmax.f32 %v218_v62, 0.0  ;;  %v264_v12 = vld [vmem:[%s2957_s0 + $0x1b0] sm:$0xff] }
  0x33   : > { %1867 = vmatpush3.bf16.msra.mxu1 %v484_v50  ;;  %1786 = vmatprep.subr.bf16.mxu0 %v475_v57  ;;  %v345_v10 = vmax.f32 %v219_v63, 0.0  ;;  %v265_v13 = vld [vmem:[%s2957_s0 + $0x1b8] sm:$0xff]  ;;  %v474_v14 = vpack.c.bf16 %v361_v2, %v360_v60  ;;  %v376_v15 = vmax.f32 %v250_v4, 0.0  ;;  %v377_v16 = vmax.f32 %v251_v5, 0.0  ;;  %v216_v18 = vld [vmem:[%s2957_s0 + $0x30] sm:$0xff]  ;;  %v230_v26 = vld [vmem:[%s2957_s0 + $0xa0] sm:$0xff] }
  0x34   : > { %1868 = vmatprep.subr.bf16.mxu1 %v491_v0  ;;  %v358_v17 = vmax.f32 %v232_v6, 0.0  ;;  %v217_v19 = vld [vmem:[%s2957_s0 + $0x38] sm:$0xff]  ;;  %v248_v20 = vld [vmem:[%s2957_s0 + $0x130] sm:$0xff]  ;;  %v490_v21 = vpack.c.bf16 %v393_v8, %v392_v3  ;;  %v359_v23 = vmax.f32 %v233_v11, 0.0  ;;  %v390_v24 = vmax.f32 %v264_v12, 0.0  ;;  %v231_v27 = vld [vmem:[%s2957_s0 + $0xa8] sm:$0xff] }
  0x35   : > { %v466_v22 = vpack.c.bf16 %v345_v10, %v344_v9  ;;  %v249_v25 = vld [vmem:[%s2957_s0 + $0x138] sm:$0xff]  ;;  %v482_v28 = vpack.c.bf16 %v377_v16, %v376_v15  ;;  %v391_v29 = vmax.f32 %v265_v13, 0.0  ;;  %v342_v30 = vmax.f32 %v216_v18, 0.0  ;;  %v262_v32 = vld [vmem:[%s2957_s0 + $0x1a0] sm:$0xff]  ;;  %v263_v33 = vld [vmem:[%s2957_s0 + $0x1a8] sm:$0xff] }
  0x36   : > { %1787 = vmatpush3.bf16.msra.mxu0 %v467_v1  ;;  %v343_v31 = vmax.f32 %v217_v19, 0.0  ;;  %v473_v34 = vpack.c.bf16 %v359_v23, %v358_v17  ;;  %v374_v35 = vmax.f32 %v248_v20, 0.0  ;;  %v375_v36 = vmax.f32 %v249_v25, 0.0  ;;  %v214_v38 = vld [vmem:[%s2957_s0 + $0x20] sm:$0xff]  ;;  %v215_v39 = vld [vmem:[%s2957_s0 + $0x28] sm:$0xff]  ;;  %v228_v45 = vld [vmem:[%s2957_s0 + $0x90] sm:$0xff] }
  0x37   : > { %1869 = vmatpush3.bf16.msra.mxu1 %v483_v7  ;;  %1788 = vmatprep.subr.bf16.mxu0 %v474_v14  ;;  %v356_v37 = vmax.f32 %v230_v26, 0.0  ;;  %v246_v40 = vld [vmem:[%s2957_s0 + $0x120] sm:$0xff]  ;;  %v489_v41 = vpack.c.bf16 %v391_v29, %v390_v24  ;;  %v357_v42 = vmax.f32 %v231_v27, 0.0  ;;  %v388_v43 = vmax.f32 %v262_v32, 0.0  ;;  %v247_v44 = vld [vmem:[%s2957_s0 + $0x128] sm:$0xff]  ;;  %v229_v46 = vld [vmem:[%s2957_s0 + $0x98] sm:$0xff] }
  0x38   : > { %1870 = vmatprep.subr.bf16.mxu1 %v490_v21  ;;  %v465_v47 = vpack.c.bf16 %v343_v31, %v342_v30  ;;  %v389_v48 = vmax.f32 %v263_v33, 0.0  ;;  %v260_v49 = vld [vmem:[%s2957_s0 + $0x190] sm:$0xff]  ;;  %v261_v50 = vld [vmem:[%s2957_s0 + $0x198] sm:$0xff]  ;;  %v481_v52 = vpack.c.bf16 %v375_v36, %v374_v35  ;;  %v340_v54 = vmax.f32 %v214_v38, 0.0  ;;  %v226_v63 = vld [vmem:[%s2957_s0 + $0x80] sm:$0xff] }
  0x39   : > { %v212_v51 = vld [vmem:[%s2957_s0 + $0x10] sm:$0xff]  ;;  %v472_v53 = vpack.c.bf16 %v357_v42, %v356_v37  ;;  %v341_v55 = vmax.f32 %v215_v39, 0.0  ;;  %v213_v56 = vld [vmem:[%s2957_s0 + $0x18] sm:$0xff]  ;;  %v372_v59 = vmax.f32 %v246_v40, 0.0  ;;  %v373_v60 = vmax.f32 %v247_v44, 0.0  ;;  %v227_v0 = vld [vmem:[%s2957_s0 + $0x88] sm:$0xff] }
  0x3a   : > { %1789 = vmatpush3.bf16.msra.mxu0 %v466_v22  ;;  %v244_v57 = vld [vmem:[%s2957_s0 + $0x110] sm:$0xff]  ;;  %v245_v58 = vld [vmem:[%s2957_s0 + $0x118] sm:$0xff]  ;;  %v354_v61 = vmax.f32 %v228_v45, 0.0  ;;  %v355_v62 = vmax.f32 %v229_v46, 0.0  ;;  %v488_v1 = vpack.c.bf16 %v389_v48, %v388_v43  ;;  %v386_v2 = vmax.f32 %v260_v49, 0.0  ;;  %v258_v4 = vld [vmem:[%s2957_s0 + $0x180] sm:$0xff] }
  0x3b   : > { %1871 = vmatpush3.bf16.msra.mxu1 %v482_v28  ;;  %1790 = vmatprep.subr.bf16.mxu0 %v473_v34  ;;  %v387_v3 = vmax.f32 %v261_v50, 0.0  ;;  %v338_v5 = vmax.f32 %v212_v51, 0.0  ;;  %v339_v6 = vmax.f32 %v213_v56, 0.0  ;;  %v370_v7 = vmax.f32 %v244_v57, 0.0  ;;  %v259_v9 = vld [vmem:[%s2957_s0 + $0x188] sm:$0xff]  ;;  %v210_v10 = vld [vmem:[%s2957_s0] sm:$0xff] }
  0x3c   : > { %1872 = vmatprep.subr.bf16.mxu1 %v489_v41  ;;  %v371_v8 = vmax.f32 %v245_v58, 0.0  ;;  %v464_v11 = vpack.c.bf16 %v341_v55, %v340_v54  ;;  %v352_v12 = vmax.f32 %v226_v63, 0.0  ;;  %v353_v13 = vmax.f32 %v227_v0, 0.0  ;;  %v211_v14 = vld [vmem:[%s2957_s0 + $0x8] sm:$0xff]  ;;  %v2451_v15 = vld [vmem:[%s2258_s18] sm:$0xff]  ;;  %v304_v26 = vld [vmem:[%s2957_s0 + $0x2f0] sm:$0xff] }
  0x3d   : > { %v2454_v16 = vld [vmem:[%s2258_s18 + $0x20] sm:$0xff]  ;;  %v480_v17 = vpack.c.bf16 %v373_v60, %v372_v59  ;;  %v471_v18 = vpack.c.bf16 %v355_v62, %v354_v61  ;;  %v2460_v20 = vld [vmem:[%s2258_s18 + $0x8] sm:$0xff]  ;;  %v487_v22 = vpack.c.bf16 %v387_v3, %v386_v2  ;;  %v384_v23 = vmax.f32 %v258_v4, 0.0  ;;  %v305_v27 = vld [vmem:[%s2957_s0 + $0x2f8] sm:$0xff] }
  0x3e   : > { %1791 = vmatpush3.bf16.msra.mxu0 %v465_v47  ;;  %v242_v19 = vld [vmem:[%s2957_s0 + $0x100] sm:$0xff]  ;;  %v2463_v21 = vld [vmem:[%s2258_s18 + $0x28] sm:$0xff]  ;;  %v385_v24 = vmax.f32 %v259_v9, 0.0  ;;  %v463_v28 = vpack.c.bf16 %v339_v6, %v338_v5  ;;  %v479_v29 = vpack.c.bf16 %v371_v8, %v370_v7  ;;  %v1679_v30 = vcombine.high %v2451_v15, %v2454_v16  ;;  %v288_v39 = vld [vmem:[%s2957_s0 + $0x270] sm:$0xff] }
  0x3f   : > { %1873 = vmatpush3.bf16.msra.mxu1 %v481_v52  ;;  %1792 = vmatprep.subr.bf16.mxu0 %v472_v53  ;;  %v243_v25 = vld [vmem:[%s2957_s0 + $0x108] sm:$0xff]  ;;  %v470_v31 = vpack.c.bf16 %v353_v13, %v352_v12  ;;  %v336_v32 = vmax.f32 %v210_v10, 0.0  ;;  %v337_v33 = vmax.f32 %v211_v14, 0.0  ;;  %v1681_v34 = vcombine.high %v2460_v20, %v2463_v21  ;;  %v289_v40 = vld [vmem:[%s2957_s0 + $0x278] sm:$0xff]  ;;  %v320_v42 = vld [vmem:[%s2957_s0 + $0x370] sm:$0xff] }
  0x40   : > { %1874 = vmatprep.subr.bf16.mxu1 %v488_v1  ;;  %v368_v35 = vmax.f32 %v242_v19, 0.0  ;;  %v369_v36 = vmax.f32 %v243_v25, 0.0  ;;  %v430_v37 = vmax.f32 %v304_v26, 0.0  ;;  %v431_v38 = vmax.f32 %v305_v27, 0.0  ;;  %1092 = vmatprep.mubr.bf16.mxu0 %v1679_v30  ;;  %v321_v43 = vld [vmem:[%s2957_s0 + $0x378] sm:$0xff]  ;;  %v2491_v44 = vld [vmem:[%s2258_s18 + $0x40] sm:$0xff] }
  0x41   : > { %v486_v41 = vpack.c.bf16 %v385_v24, %v384_v23  ;;  %1212 = vmatprep.mubr.bf16.mxu1 %v1681_v34  ;;  %v462_v45 = vpack.c.bf16 %v337_v33, %v336_v32  ;;  %v414_v46 = vmax.f32 %v288_v39, 0.0  ;;  %v415_v47 = vmax.f32 %v289_v40, 0.0  ;;  %v2494_v48 = vld [vmem:[%s2258_s18 + $0x60] sm:$0xff]  ;;  %v303_v50 = vld [vmem:[%s2957_s0 + $0x2e8] sm:$0xff]  ;;  %v300_v60 = vld [vmem:[%s2957_s0 + $0x2d0] sm:$0xff] }
  0x42   : > { %1793 = vmatpush3.bf16.msra.mxu0 %v464_v11  ;;  %v302_v49 = vld [vmem:[%s2957_s0 + $0x2e0] sm:$0xff]  ;;  %v478_v51 = vpack.c.bf16 %v369_v36, %v368_v35  ;;  %v509_v52 = vpack.c.bf16 %v431_v38, %v430_v37  ;;  %v446_v53 = vmax.f32 %v320_v42, 0.0  ;;  %v447_v54 = vmax.f32 %v321_v43, 0.0  ;;  %v287_v57 = vld [vmem:[%s2957_s0 + $0x268] sm:$0xff]  ;;  %v301_v61 = vld [vmem:[%s2957_s0 + $0x2d8] sm:$0xff] }
  0x43   : > { %1875 = vmatpush3.bf16.msra.mxu1 %v480_v17  ;;  %1794 = vmatprep.subr.bf16.mxu0 %v471_v18  ;;  %v318_v55 = vld [vmem:[%s2957_s0 + $0x360] sm:$0xff]  ;;  %v1678_v58 = vcombine.low %v2451_v15, %v2454_v16  ;;  %v319_v59 = vld [vmem:[%s2957_s0 + $0x368] sm:$0xff]  ;;  %v1680_v62 = vcombine.low %v2460_v20, %v2463_v21  ;;  %v1687_v63 = vcombine.high %v2491_v44, %v2494_v48  ;;  %v428_v2 = vmax.f32 %v302_v49, 0.0  ;;  %v316_v14 = vld [vmem:[%s2957_s0 + $0x350] sm:$0xff] }
  0x44   : > { %1876 = vmatprep.subr.bf16.mxu1 %v487_v22  ;;  %v286_v56 = vld [vmem:[%s2957_s0 + $0x260] sm:$0xff]  ;;  %v2527_v0 = vld [vmem:[%s2258_s18 + $0x48] sm:$0xff]  ;;  %v429_v3 = vmax.f32 %v303_v50, 0.0  ;;  %v501_v4 = vpack.c.bf16 %v415_v47, %v414_v46  ;;  %v444_v5 = vmax.f32 %v318_v55, 0.0  ;;  %v413_v7 = vmax.f32 %v287_v57, 0.0  ;;  %v317_v15 = vld [vmem:[%s2957_s0 + $0x358] sm:$0xff] }
  0x45   : > { %v2530_v1 = vld [vmem:[%s2258_s18 + $0x68] sm:$0xff]  ;;  %v412_v6 = vmax.f32 %v286_v56, 0.0  ;;  %v517_v8 = vpack.c.bf16 %v447_v54, %v446_v53  ;;  %v445_v9 = vmax.f32 %v319_v59, 0.0  ;;  %v426_v10 = vmax.f32 %v300_v60, 0.0  ;;  %v284_v17 = vld [vmem:[%s2957_s0 + $0x250] sm:$0xff]  ;;  %v285_v18 = vld [vmem:[%s2957_s0 + $0x258] sm:$0xff] }
  0x46   : > { %1795 = vmatpush3.bf16.msra.mxu0 %v463_v28  ;;  %v427_v11 = vmax.f32 %v301_v61, 0.0  ;;  %v2179_v12 = vmov 0   ;;  %v1689_v13 = vcombine.high %v2527_v0, %v2530_v1  ;;  %v508_v16 = vpack.c.bf16 %v429_v3, %v428_v2  ;;  %v298_v20 = vld [vmem:[%s2957_s0 + $0x2c0] sm:$0xff]  ;;  %v299_v21 = vld [vmem:[%s2957_s0 + $0x2c8] sm:$0xff]  ;;  %v297_v42 = vld [vmem:[%s2957_s0 + $0x2b8] sm:$0xff] }
  0x47   : > { %1877 = vmatpush3.bf16.msra.mxu1 %v479_v29  ;;  %1796 = vmatprep.subr.bf16.mxu0 %v470_v31  ;;  %v500_v19 = vpack.c.bf16 %v413_v7, %v412_v6  ;;  %v516_v22 = vpack.c.bf16 %v445_v9, %v444_v5  ;;  %v2554_v23 = vld [vmem:[%s2258_s18 + $0x80] sm:$0xff]  ;;  %v2560_v25 = vld [vmem:[%s2258_s18 + $0x88] sm:$0xff]  ;;  %v442_v26 = vmax.f32 %v316_v14, 0.0  ;;  %v443_v27 = vmax.f32 %v317_v15, 0.0  ;;  %v313_v49 = vld [vmem:[%s2957_s0 + $0x338] sm:$0xff] }
  0x48   : > { %1878 = vmatprep.subr.bf16.mxu1 %v486_v41  ;;  %v2557_v24 = vld [vmem:[%s2258_s18 + $0xa0] sm:$0xff]  ;;  %v507_v28 = vpack.c.bf16 %v427_v11, %v426_v10  ;;  %v2564_v29 = vld [vmem:[%s2258_s18 + $0xa8] sm:$0xff]  ;;  %v410_v32 = vmax.f32 %v284_v17, 0.0  ;;  %v411_v33 = vmax.f32 %v285_v18, 0.0  ;;  %v1686_v34 = vcombine.low %v2491_v44, %v2494_v48  ;;  %v296_v41 = vld [vmem:[%s2957_s0 + $0x2b0] sm:$0xff] }
  0x49   : > { %v314_v30 = vld [vmem:[%s2957_s0 + $0x340] sm:$0xff]  ;;  %v315_v31 = vld [vmem:[%s2957_s0 + $0x348] sm:$0xff]  ;;  %v424_v35 = vmax.f32 %v298_v20, 0.0  ;;  %v425_v36 = vmax.f32 %v299_v21, 0.0  ;;  %v1688_v39 = vcombine.low %v2527_v0, %v2530_v1  ;;  %v1695_v40 = vcombine.high %v2554_v23, %v2557_v24  ;;  %v312_v48 = vld [vmem:[%s2957_s0 + $0x330] sm:$0xff] }
  0x4a   : > { %1797 = vmatpush3.bf16.msra.mxu0 %v462_v45  ;;  %v282_v37 = vld [vmem:[%s2957_s0 + $0x240] sm:$0xff]  ;;  %v283_v38 = vld [vmem:[%s2957_s0 + $0x248] sm:$0xff]  ;;  %v1697_v43 = vcombine.high %v2560_v25, %v2564_v29  ;;  %v515_v44 = vpack.c.bf16 %v443_v27, %v442_v26  ;;  %v440_v45 = vmax.f32 %v314_v30, 0.0  ;;  %v441_v46 = vmax.f32 %v315_v31, 0.0  ;;  %v280_v55 = vld [vmem:[%s2957_s0 + $0x230] sm:$0xff] }
  0x4b   : > { %1879 = vmatpush3.bf16.msra.mxu1 %v478_v51  ;;  %1946 = vmatprep.subr.bf16.mxu0 %v509_v52  ;;  %v499_v47 = vpack.c.bf16 %v411_v33, %v410_v32  ;;  %v408_v50 = vmax.f32 %v282_v37, 0.0  ;;  %v409_v51 = vmax.f32 %v283_v38, 0.0  ;;  %v506_v52 = vpack.c.bf16 %v425_v36, %v424_v35  ;;  %v281_v56 = vld [vmem:[%s2957_s0 + $0x238] sm:$0xff]  ;;  %v294_v57 = vld [vmem:[%s2957_s0 + $0x2a0] sm:$0xff]  ;;  %v2622_v1 = vld [vmem:[%s2258_s18 + $0xe8] sm:$0xff] }
  0x4c   : > { %1420 = vmatprep.subr.bf16.mxu1 %v2179_v12  ;;  %v422_v53 = vmax.f32 %v296_v41, 0.0  ;;  %v423_v54 = vmax.f32 %v297_v42, 0.0  ;;  %v514_v59 = vpack.c.bf16 %v441_v46, %v440_v45  ;;  %v2612_v60 = vld [vmem:[%s2258_s18 + $0xc0] sm:$0xff]  ;;  %v439_v0 = vmax.f32 %v313_v49, 0.0  ;;  %v293_v17 = vld [vmem:[%s2957_s0 + $0x298] sm:$0xff]  ;;  %v276_v30 = vld [vmem:[%s2957_s0 + $0x210] sm:$0xff] }
  0x4d   : > { %1093 = vmatmul.mubr.bf16.vlgmr.msra.gmra.mxu0 %v1678_v58  ;;  %v295_v58 = vld [vmem:[%s2957_s0 + $0x2a8] sm:$0xff]  ;;  %v2615_v61 = vld [vmem:[%s2258_s18 + $0xe0] sm:$0xff]  ;;  %v498_v2 = vpack.c.bf16 %v409_v51, %v408_v50  ;;  %v406_v5 = vmax.f32 %v280_v55, 0.0  ;;  %v407_v6 = vmax.f32 %v281_v56, 0.0  ;;  %v1694_v7 = vcombine.low %v2554_v23, %v2557_v24  ;;  %v309_v23 = vld [vmem:[%s2957_s0 + $0x318] sm:$0xff] }
  0x4e   : > { %1213 = vmatmul.mubr.bf16.vlgmr.msra.gmra.mxu1 %v1680_v62  ;;  %1947 = vmatpush3.bf16.msra.mxu0 %v501_v4  ;;  %v2618_v62 = vld [vmem:[%s2258_s18 + $0xc8] sm:$0xff]  ;;  %v310_v3 = vld [vmem:[%s2957_s0 + $0x320] sm:$0xff]  ;;  %v420_v9 = vmax.f32 %v294_v57, 0.0  ;;  %v421_v10 = vmax.f32 %v295_v58, 0.0  ;;  %v1696_v14 = vcombine.low %v2560_v25, %v2564_v29  ;;  %v1703_v15 = vcombine.high %v2612_v60, %v2615_v61  ;;  %v277_v31 = vld [vmem:[%s2957_s0 + $0x218] sm:$0xff] }
  0x4f   : > { %1421 = vmatpush1.bf16.msra.mxu1 %v517_v8  ;;  %1100 = vmatprep.mubr.bf16.mxu0 %v1687_v63  ;;  %v438_v63 = vmax.f32 %v312_v48, 0.0  ;;  %v311_v4 = vld [vmem:[%s2957_s0 + $0x328] sm:$0xff]  ;;  %v505_v8 = vpack.c.bf16 %v423_v54, %v422_v53  ;;  %v278_v11 = vld [vmem:[%s2957_s0 + $0x220] sm:$0xff]  ;;  %v1705_v18 = vcombine.high %v2618_v62, %v2622_v1  ;;  %v436_v20 = vmax.f32 %v310_v3, 0.0 }
  0x50   : > { %1220 = vmatprep.mubr.bf16.mxu1 %v1689_v13  ;;  %1422 = vmatprep.subr.bf16.mxu1 %v2179_v12  ;;  %v279_v13 = vld [vmem:[%s2957_s0 + $0x228] sm:$0xff]  ;;  %v437_v21 = vmax.f32 %v311_v4, 0.0  ;;  %v497_v24 = vpack.c.bf16 %v407_v6, %v406_v5  ;;  %v404_v25 = vmax.f32 %v278_v11, 0.0  ;;  %v504_v27 = vpack.c.bf16 %v421_v10, %v420_v9  ;;  %v290_v32 = vld [vmem:[%s2957_s0 + $0x280] sm:$0xff] }
  0x51   : > { %1948 = vmatprep.subr.bf16.mxu0 %v508_v16  ;;  %v292_v16 = vld [vmem:[%s2957_s0 + $0x290] sm:$0xff]  ;;  %v405_v26 = vmax.f32 %v279_v13, 0.0  ;;  %v419_v29 = vmax.f32 %v293_v17, 0.0  ;;  %v291_v33 = vld [vmem:[%s2957_s0 + $0x288] sm:$0xff]  ;;  %v2673_v35 = vld [vmem:[%s2258_s18 + $0x120] sm:$0xff]  ;;  %v403_v45 = vmax.f32 %v277_v31, 0.0  ;;  %v1702_v46 = vcombine.low %v2612_v60, %v2615_v61 }
  0x52   : > { %1949 = vmatpush3.bf16.msra.mxu0 %v500_v19  ;;  %v513_v19 = vpack.c.bf16 %v439_v0, %v438_v63  ;;  %v2676_v36 = vld [vmem:[%s2258_s18 + $0x108] sm:$0xff]  ;;  %v512_v37 = vpack.c.bf16 %v437_v21, %v436_v20  ;;  %v306_v41 = vld [vmem:[%s2957_s0 + $0x300] sm:$0xff]  ;;  %v416_v48 = vmax.f32 %v290_v32, 0.0  ;;  %v417_v49 = vmax.f32 %v291_v33, 0.0 }
  0x53   : > { %1423 = vmatpush1.bf16.msra.mxu1 %v516_v22  ;;  %1950 = vmatprep.subr.bf16.mxu0 %v507_v28  ;;  %v308_v22 = vld [vmem:[%s2957_s0 + $0x310] sm:$0xff]  ;;  %v418_v28 = vmax.f32 %v292_v16, 0.0  ;;  %v307_v42 = vld [vmem:[%s2957_s0 + $0x308] sm:$0xff]  ;;  %v274_v50 = vld [vmem:[%s2957_s0 + $0x200] sm:$0xff]  ;;  %v432_v56 = vmax.f32 %v306_v41, 0.0 }
  0x54   : > { %1424 = vmatprep.subr.bf16.mxu1 %v2179_v12  ;;  %v434_v38 = vmax.f32 %v308_v22, 0.0  ;;  %v275_v51 = vld [vmem:[%s2957_s0 + $0x208] sm:$0xff]  ;;  %v433_v57 = vmax.f32 %v307_v42, 0.0  ;;  %v334_v58 = vld [vmem:[%s2957_s0 + $0x3e0] sm:$0xff]  ;;  %v400_v61 = vmax.f32 %v274_v50, 0.0  ;;  %v502_v63 = vpack.c.bf16 %v417_v49, %v416_v48 }
  0x55   : > { %1101 = vmatmul.mubr.bf16.gmra.mxu0 %v1686_v34  ;;  %v2670_v34 = vld [vmem:[%s2258_s18 + $0x100] sm:$0xff]  ;;  %v460_v4 = vmax.f32 %v334_v58, 0.0  ;;  %v570_v6 = vld [vmem:[%s2258_s18 + $0x168] sm:$0xff] }
  0x56   : > { %1221 = vmatmul.mubr.bf16.gmra.mxu1 %v1688_v39  ;;  %1108 = vmatprep.mubr.bf16.mxu0 %v1695_v40  ;;  %v435_v39 = vmax.f32 %v309_v23, 0.0  ;;  %v562_v40 = vld [vmem:[%s2258_s18 + $0x128] sm:$0xff]  ;;  %v1711_v53 = vcombine.high %v2670_v34, %v2673_v35  ;;  %v565_v0 = vld [vmem:[%s2258_s18 + $0x140] sm:$0xff]  ;;  %v510_v3 = vpack.c.bf16 %v433_v57, %v432_v56  ;;  %v1710_v10 = vcombine.low %v2670_v34, %v2673_v35 }
  0x57   : > { %1228 = vmatprep.mubr.bf16.mxu1 %v1697_v43  ;;  %1425 = vmatpush1.bf16.msra.mxu1 %v515_v44  ;;  %v496_v43 = vpack.c.bf16 %v405_v26, %v404_v25  ;;  %v402_v44 = vmax.f32 %v276_v30, 0.0  ;;  %v1713_v54 = vcombine.high %v2676_v36, %v562_v40  ;;  %v1712_v11 = vcombine.low %v2676_v36, %v562_v40  ;;  %v573_v20 = vld [vmem:[%s2258_s18 + $0x180] sm:$0xff]  ;;  %v574_v22 = vld [vmem:[%s2258_s18 + $0x188] sm:$0xff] }
  0x58   : > { %1426 = vmatprep.subr.bf16.mxu1 %v2179_v12  ;;  %1951 = vmatpush3.bf16.msra.mxu0 %v499_v47  ;;  %v503_v47 = vpack.c.bf16 %v419_v29, %v418_v28  ;;  %v511_v55 = vpack.c.bf16 %v435_v39, %v434_v38  ;;  %v577_v21 = vld [vmem:[%s2258_s18 + $0x1a0] sm:$0xff]  ;;  %v578_v26 = vld [vmem:[%s2258_s18 + $0x1a8] sm:$0xff]  ;;  %v329_v28 = vld [vmem:[%s2957_s0 + $0x3b8] sm:$0xff] }
  0x59   : > { %1952 = vmatprep.subr.bf16.mxu0 %v506_v52  ;;  %v1704_v52 = vcombine.low %v2618_v62, %v2622_v1  ;;  %v495_v60 = vpack.c.bf16 %v403_v45, %v402_v44  ;;  %v401_v62 = vmax.f32 %v275_v51, 0.0  ;;  %v569_v1 = vld [vmem:[%s2258_s18 + $0x160] sm:$0xff]  ;;  %v1727_v31 = vcombine.high %v573_v20, %v577_v21  ;;  %v582_v40 = vld [vmem:[%s2258_s18 + $0x1c8] sm:$0xff]  ;;  %v324_v45 = vld [vmem:[%s2957_s0 + $0x390] sm:$0xff] }
  0x5a   : > { %v1719_v13 = vcombine.high %v565_v0, %v569_v1  ;;  %v1718_v29 = vcombine.low %v565_v0, %v569_v1  ;;  %v1729_v32 = vcombine.high %v574_v22, %v578_v26  ;;  %v455_v35 = vmax.f32 %v329_v28, 0.0  ;;  %v326_v36 = vld [vmem:[%s2957_s0 + $0x3a0] sm:$0xff]  ;;  %v586_v44 = vld [vmem:[%s2258_s18 + $0x1e8] sm:$0xff]  ;;  %v536_v28 = vld [vmem:[%s2258_s18 + $0x58] sm:$0xff] }
  0x5b   : > { %1427 = vmatpush1.bf16.msra.mxu1 %v514_v59  ;;  %v335_v59 = vld [vmem:[%s2957_s0 + $0x3e8] sm:$0xff]  ;;  %v494_v9 = vpack.c.bf16 %v401_v62, %v400_v61  ;;  %v581_v38 = vld [vmem:[%s2258_s18 + $0x1c0] sm:$0xff]  ;;  %v452_v42 = vmax.f32 %v326_v36, 0.0  ;;  %v1728_v48 = vcombine.low %v574_v22, %v578_v26  ;;  %v1737_v50 = vcombine.high %v582_v40, %v586_v44  ;;  %v535_v26 = vld [vmem:[%s2258_s18 + $0x50] sm:$0xff] }
  0x5c   : > { %1428 = vmatprep.subr.bf16.mxu1 %v2179_v12  ;;  %1953 = vmatpush3.bf16.msra.mxu0 %v498_v2  ;;  %v566_v2 = vld [vmem:[%s2258_s18 + $0x148] sm:$0xff]  ;;  %v461_v5 = vmax.f32 %v335_v59, 0.0  ;;  %v585_v39 = vld [vmem:[%s2258_s18 + $0x1e0] sm:$0xff]  ;;  %v1736_v0 = vcombine.low %v582_v40, %v586_v44  ;;  %v544_v36 = vld [vmem:[%s2258_s18 + $0x98] sm:$0xff] }
  0x5d   : > { %1109 = vmatmul.mubr.bf16.gmra.mxu0 %v1694_v7  ;;  %1954 = vmatprep.subr.bf16.mxu0 %v505_v8  ;;  %v332_v7 = vld [vmem:[%s2957_s0 + $0x3d0] sm:$0xff]  ;;  %v333_v8 = vld [vmem:[%s2957_s0 + $0x3d8] sm:$0xff]  ;;  %v1720_v30 = vcombine.low %v566_v2, %v570_v6  ;;  %v1735_v49 = vcombine.high %v581_v38, %v585_v39  ;;  %v589_v56 = vld [vmem:[%s2258_s18 + $0x200] sm:$0xff] }
  0x5e   : > { %1229 = vmatmul.mubr.bf16.gmra.mxu1 %v1696_v14  ;;  %1116 = vmatprep.mubr.bf16.mxu0 %v1703_v15  ;;  %v1721_v14 = vcombine.high %v566_v2, %v570_v6  ;;  %v524_v15 = vpack.c.bf16 %v461_v5, %v460_v4  ;;  %v458_v16 = vmax.f32 %v332_v7, 0.0  ;;  %v459_v17 = vmax.f32 %v333_v8, 0.0  ;;  %v593_v57 = vld [vmem:[%s2258_s18 + $0x220] sm:$0xff]  ;;  %v590_v61 = vld [vmem:[%s2258_s18 + $0x208] sm:$0xff]  ;;  %v552_v44 = vld [vmem:[%s2258_s18 + $0xd8] sm:$0xff] }
  0x5f   : > { %1236 = vmatprep.mubr.bf16.mxu1 %v1705_v18  ;;  %1429 = vmatpush1.bf16.msra.mxu1 %v513_v19  ;;  %v330_v18 = vld [vmem:[%s2957_s0 + $0x3c0] sm:$0xff]  ;;  %v331_v19 = vld [vmem:[%s2957_s0 + $0x3c8] sm:$0xff]  ;;  %v1743_v1 = vcombine.high %v589_v56, %v593_v57  ;;  %v1742_v8 = vcombine.low %v589_v56, %v593_v57 }
  0x60   : > { %1430 = vmatprep.subr.bf16.mxu1 %v2179_v12  ;;  %1955 = vmatpush3.bf16.msra.mxu0 %v497_v24  ;;  %v523_v23 = vpack.c.bf16 %v459_v17, %v458_v16  ;;  %v456_v24 = vmax.f32 %v330_v18, 0.0  ;;  %v457_v25 = vmax.f32 %v331_v19, 0.0  ;;  %v594_v62 = vld [vmem:[%s2258_s18 + $0x228] sm:$0xff]  ;;  %v597_v4 = vld [vmem:[%s2258_s18 + $0x240] sm:$0xff]  ;;  %v527_v18 = vld [vmem:[%s2258_s18 + $0x10] sm:$0xff] }
  0x61   : > { %1956 = vmatprep.subr.bf16.mxu0 %v504_v27  ;;  %v328_v27 = vld [vmem:[%s2957_s0 + $0x3b0] sm:$0xff]  ;;  %v1745_v2 = vcombine.high %v590_v61, %v594_v62  ;;  %v601_v5 = vld [vmem:[%s2258_s18 + $0x260] sm:$0xff]  ;;  %v598_v6 = vld [vmem:[%s2258_s18 + $0x248] sm:$0xff] }
  0x62   : > { %v522_v33 = vpack.c.bf16 %v457_v25, %v456_v24  ;;  %v454_v34 = vmax.f32 %v328_v27, 0.0  ;;  %v602_v7 = vld [vmem:[%s2258_s18 + $0x268] sm:$0xff]  ;;  %v531_v19 = vld [vmem:[%s2258_s18 + $0x30] sm:$0xff] }
  0x63   : > { %1431 = vmatpush1.bf16.msra.mxu1 %v512_v37  ;;  %v327_v37 = vld [vmem:[%s2957_s0 + $0x3a8] sm:$0xff]  ;;  %v1683_v24 = vcombine.high %v527_v18, %v531_v19  ;;  %v539_v27 = vld [vmem:[%s2258_s18 + $0x70] sm:$0xff] }
  0x64   : > { %1432 = vmatprep.subr.bf16.mxu1 %v2179_v12  ;;  %1957 = vmatpush3.bf16.msra.mxu0 %v496_v43  ;;  %v521_v41 = vpack.c.bf16 %v455_v35, %v454_v34  ;;  %v453_v43 = vmax.f32 %v327_v37, 0.0  ;;  %v543_v34 = vld [vmem:[%s2258_s18 + $0x90] sm:$0xff]  ;;  %v548_v37 = vld [vmem:[%s2258_s18 + $0xb8] sm:$0xff] }
  0x65   : > { %1117 = vmatmul.mubr.bf16.gmra.mxu0 %v1702_v46  ;;  %1958 = vmatprep.subr.bf16.mxu0 %v503_v47  ;;  %v325_v46 = vld [vmem:[%s2957_s0 + $0x398] sm:$0xff]  ;;  %v1726_v47 = vcombine.low %v573_v20, %v577_v21  ;;  %v547_v35 = vld [vmem:[%s2258_s18 + $0xb0] sm:$0xff] }
  0x66   : > { %1237 = vmatmul.mubr.bf16.gmra.mxu1 %v1704_v52  ;;  %1124 = vmatprep.mubr.bf16.mxu0 %v1711_v53  ;;  %v520_v51 = vpack.c.bf16 %v453_v43, %v452_v42  ;;  %v450_v52 = vmax.f32 %v324_v45, 0.0  ;;  %v451_v53 = vmax.f32 %v325_v46, 0.0  ;;  %v528_v20 = vld [vmem:[%s2258_s18 + $0x18] sm:$0xff]  ;;  %v1699_v40 = vcombine.high %v543_v34, %v547_v35  ;;  %v551_v42 = vld [vmem:[%s2258_s18 + $0xd0] sm:$0xff] }
  0x67   : > { %1244 = vmatprep.mubr.bf16.mxu1 %v1713_v54  ;;  %1433 = vmatpush1.bf16.msra.mxu1 %v511_v55  ;;  %v322_v54 = vld [vmem:[%s2957_s0 + $0x380] sm:$0xff]  ;;  %v323_v55 = vld [vmem:[%s2957_s0 + $0x388] sm:$0xff]  ;;  %v532_v21 = vld [vmem:[%s2258_s18 + $0x38] sm:$0xff]  ;;  %v1698_v46 = vcombine.low %v543_v34, %v547_v35 }
  0x68   : > { %1434 = vmatprep.subr.bf16.mxu1 %v2179_v12  ;;  %1959 = vmatpush3.bf16.msra.mxu0 %v495_v60  ;;  %v519_v58 = vpack.c.bf16 %v451_v53, %v450_v52  ;;  %v448_v59 = vmax.f32 %v322_v54, 0.0  ;;  %v449_v60 = vmax.f32 %v323_v55, 0.0  ;;  %v1685_v25 = vcombine.high %v528_v20, %v532_v21  ;;  %v555_v43 = vld [vmem:[%s2258_s18 + $0xf0] sm:$0xff]  ;;  %v556_v45 = vld [vmem:[%s2258_s18 + $0xf8] sm:$0xff] }
  0x69   : > { %1960 = vmatprep.subr.bf16.mxu0 %v502_v63  ;;  %v1734_v63 = vcombine.low %v581_v38, %v585_v39  ;;  %v1690_v38 = vcombine.low %v535_v26, %v539_v27  ;;  %v560_v52 = vld [vmem:[%s2258_s18 + $0x118] sm:$0xff]  ;;  %v1706_v54 = vcombine.low %v551_v42, %v555_v43  ;;  %v1708_v55 = vcombine.low %v552_v44, %v556_v45  ;;  %v607_v34 = vld [vmem:[%s2258_s18 + $0x290] sm:$0xff] }
  0x6a   : > { %v564_v53 = vld [vmem:[%s2258_s18 + $0x138] sm:$0xff] }
  0x6b   : > { %1435 = vmatpush1.bf16.msra.mxu1 %v510_v3  ;;  %v518_v3 = vpack.c.bf16 %v449_v60, %v448_v59  ;;  %v1717_v57 = vcombine.high %v560_v52, %v564_v53  ;;  %v571_v59 = vld [vmem:[%s2258_s18 + $0x170] sm:$0xff]  ;;  %v568_v60 = vld [vmem:[%s2258_s18 + $0x158] sm:$0xff] }
  0x6c   : > { %1438 = vmatprep.subr.bf16.mxu1 %v2179_v12  ;;  %1961 = vmatpush3.bf16.msra.mxu0 %v494_v9  ;;  %v1744_v9 = vcombine.low %v590_v61, %v594_v62  ;;  %v572_v61 = vld [vmem:[%s2258_s18 + $0x178] sm:$0xff] }
  0x6d   : > { %1125 = vmatmul.mubr.bf16.gmra.mxu0 %v1710_v10  ;;  %v1751_v10 = vcombine.high %v597_v4, %v601_v5  ;;  %v608_v35 = vld [vmem:[%s2258_s18 + $0x298] sm:$0xff] }
  0x6e   : > { %1245 = vmatmul.mubr.bf16.gmra.mxu1 %v1712_v11  ;;  %1132 = vmatprep.mubr.bf16.mxu0 %v1719_v13  ;;  %v1753_v11 = vcombine.high %v598_v6, %v602_v7  ;;  %v606_v13 = vld [vmem:[%s2258_s18 + $0x288] sm:$0xff] }
  0x6f   : > { %1252 = vmatprep.mubr.bf16.mxu1 %v1721_v14  ;;  %1439 = vmatpush2.bf16.msra.mxu1 %v524_v15  ;;  %v1750_v14 = vcombine.low %v597_v4, %v601_v5  ;;  %v1752_v15 = vcombine.low %v598_v6, %v602_v7  ;;  %v1761_v17 = vcombine.high %v606_v13, %v606_v13  ;;  %v576_v4 = vld [vmem:[%s2258_s18 + $0x198] sm:$0xff] }
  0x70   : > { %1440 = vmatprep.subr.bf16.mxu1 %v2179_v12  ;;  %v580_v5 = vld [vmem:[%s2258_s18 + $0x1b8] sm:$0xff]  ;;  %v1724_v7 = vcombine.low %v568_v60, %v572_v61 }
  0x73   : > { %1441 = vmatpush2.bf16.msra.mxu1 %v523_v23  ;;  %v1760_v23 = vcombine.low %v606_v13, %v606_v13  ;;  %v588_v13 = vld [vmem:[%s2258_s18 + $0x1f8] sm:$0xff] }
  0x74   : > { %1442 = vmatprep.subr.bf16.mxu1 %v2179_v12 }
  0x75   : > { %1133 = vmatmul.mubr.bf16.gmra.mxu0 %v1718_v29  ;;  %v540_v29 = vld [vmem:[%s2258_s18 + $0x78] sm:$0xff] }
  0x76   : > { %1253 = vmatmul.mubr.bf16.gmra.mxu1 %v1720_v30  ;;  %1140 = vmatprep.mubr.bf16.mxu0 %v1727_v31  ;;  %v1682_v30 = vcombine.low %v527_v18, %v531_v19  ;;  %v1684_v31 = vcombine.low %v528_v20, %v532_v21  ;;  %v1692_v39 = vcombine.low %v536_v28, %v540_v29  ;;  %v591_v18 = vld [vmem:[%s2258_s18 + $0x210] sm:$0xff]  ;;  %v592_v20 = vld [vmem:[%s2258_s18 + $0x218] sm:$0xff] }
  0x77   : > { %1260 = vmatprep.mubr.bf16.mxu1 %v1729_v32  ;;  %1443 = vmatpush2.bf16.msra.mxu1 %v522_v33  ;;  %v1691_v32 = vcombine.high %v535_v26, %v539_v27  ;;  %v1693_v33 = vcombine.high %v536_v28, %v540_v29  ;;  %v595_v19 = vld [vmem:[%s2258_s18 + $0x230] sm:$0xff]  ;;  %v596_v21 = vld [vmem:[%s2258_s18 + $0x238] sm:$0xff] }
  0x78   : > { %1444 = vmatprep.subr.bf16.mxu1 %v2179_v12  ;;  %v599_v26 = vld [vmem:[%s2258_s18 + $0x250] sm:$0xff]  ;;  %v600_v28 = vld [vmem:[%s2258_s18 + $0x258] sm:$0xff] }
  0x79   : > { %v603_v27 = vld [vmem:[%s2258_s18 + $0x270] sm:$0xff]  ;;  %v604_v29 = vld [vmem:[%s2258_s18 + $0x278] sm:$0xff] }
  0x7b   : > { %1445 = vmatpush2.bf16.msra.mxu1 %v521_v41  ;;  %v1701_v41 = vcombine.high %v544_v36, %v548_v37 }
  0x7c   : > { %1446 = vmatprep.subr.bf16.mxu1 %v2179_v12 }
  0x7d   : > { %1141 = vmatmul.mubr.bf16.gmra.mxu0 %v1726_v47  ;;  %v1700_v47 = vcombine.low %v544_v36, %v548_v37  ;;  %v1754_v36 = vcombine.low %v599_v26, %v603_v27  ;;  %v1756_v37 = vcombine.low %v600_v28, %v604_v29 }
  0x7e   : > { %1261 = vmatmul.mubr.bf16.gmra.mxu1 %v1728_v48  ;;  %1148 = vmatprep.mubr.bf16.mxu0 %v1735_v49  ;;  %v1707_v48 = vcombine.high %v551_v42, %v555_v43  ;;  %v1709_v49 = vcombine.high %v552_v44, %v556_v45 }
  0x7f   : > { %1268 = vmatprep.mubr.bf16.mxu1 %v1737_v50  ;;  %1447 = vmatpush2.bf16.msra.mxu1 %v520_v51  ;;  %v559_v50 = vld [vmem:[%s2258_s18 + $0x110] sm:$0xff] }
  0x80   : > { %1448 = vmatprep.subr.bf16.mxu1 %v2179_v12  ;;  %v563_v51 = vld [vmem:[%s2258_s18 + $0x130] sm:$0xff] }
  0x81   : > { %v1715_v56 = vcombine.high %v559_v50, %v563_v51  ;;  %v1714_v62 = vcombine.low %v559_v50, %v563_v51 }
  0x83   : > { %1449 = vmatpush2.bf16.msra.mxu1 %v519_v58  ;;  %v567_v58 = vld [vmem:[%s2258_s18 + $0x150] sm:$0xff] }
  0x84   : > { %1450 = vmatprep.subr.bf16.mxu1 %v2179_v12  ;;  %v605_v12 = vld [vmem:[%s2258_s18 + $0x280] sm:$0xff]  ;;  %v1722_v6 = vcombine.low %v567_v58, %v571_v59 }
  0x85   : > { %1149 = vmatmul.mubr.bf16.gmra.mxu0 %v1734_v63  ;;  %v1759_v16 = vcombine.high %v605_v12, %v605_v12  ;;  %v1758_v22 = vcombine.low %v605_v12, %v605_v12  ;;  %v1716_v63 = vcombine.low %v560_v52, %v564_v53  ;;  %v584_v12 = vld [vmem:[%s2258_s18 + $0x1d8] sm:$0xff] }
  0x86   : > { %1269 = vmatmul.mubr.bf16.gmra.mxu1 %v1736_v0  ;;  %1156 = vmatprep.mubr.bf16.mxu0 %v1743_v1  ;;  %v1723_v0 = vcombine.high %v567_v58, %v571_v59  ;;  %v1725_v1 = vcombine.high %v568_v60, %v572_v61 }
  0x87   : > { %1276 = vmatprep.mubr.bf16.mxu1 %v1745_v2  ;;  %1451 = vmatpush2.bf16.msra.mxu1 %v518_v3  ;;  %v575_v2 = vld [vmem:[%s2258_s18 + $0x190] sm:$0xff] }
  0x88   : > { %v579_v3 = vld [vmem:[%s2258_s18 + $0x1b0] sm:$0xff] }
  0x8d   : > { %1157 = vmatmul.mubr.bf16.gmra.mxu0 %v1742_v8  ;;  %v1731_v8 = vcombine.high %v575_v2, %v579_v3 }
  0x8e   : > { %1277 = vmatmul.mubr.bf16.gmra.mxu1 %v1744_v9  ;;  %1164 = vmatprep.mubr.bf16.mxu0 %v1751_v10  ;;  %v1733_v9 = vcombine.high %v576_v4, %v580_v5  ;;  %v583_v10 = vld [vmem:[%s2258_s18 + $0x1d0] sm:$0xff] }
  0x8f   : > { %1284 = vmatprep.mubr.bf16.mxu1 %v1753_v11  ;;  %v587_v11 = vld [vmem:[%s2258_s18 + $0x1f0] sm:$0xff]  ;;  %s199_s18 = smul.u32 21, %s2166_s12 }
  0x91   : > { %p202_p7 = scmp.lt.s32.totalorder %s199_s18, 125 }
  0x93   : > { %s2970_s18 = smov (!%p202_p7, %s199_s18), 125 }
  0x94   : > { %s1677_s12 = sshll.u32 %s2970_s18, 3 }
  0x95   : > { %1165 = vmatmul.mubr.bf16.gmra.mxu0 %v1750_v14  ;;  %v1730_v14 = vcombine.low %v575_v2, %v579_v3  ;;  %s2875_s6 = scalar_lea.vmem %s2959_s2, %s1677_s12 }
  0x96   : > { %1285 = vmatmul.mubr.bf16.gmra.mxu1 %v1752_v15  ;;  %1172 = vmatprep.mubr.bf16.mxu0 %v1759_v16  ;;  %v1732_v15 = vcombine.low %v576_v4, %v580_v5  ;;  %v1739_v16 = vcombine.high %v583_v10, %v587_v11 }
  0x97   : > { %1292 = vmatprep.mubr.bf16.mxu1 %v1761_v17  ;;  %v1741_v17 = vcombine.high %v584_v12, %v588_v13 }
  0x9d   : > { %1173 = vmatmul.mubr.bf16.gmra.mxu0 %v1758_v22  ;;  %v1738_v22 = vcombine.low %v583_v10, %v587_v11 }
  0x9e   : > { %1293 = vmatmul.mubr.bf16.gmra.mxu1 %v1760_v23  ;;  %1332 = vmatprep.mubr.bf16.mxu0 %v1683_v24  ;;  %v1740_v23 = vcombine.low %v584_v12, %v588_v13  ;;  %v1747_v24 = vcombine.high %v591_v18, %v595_v19 }
  0x9f   : > { %1766 = vmatprep.mubr.msk.bf16.mxu1 %vm1026_vm0, %v1685_v25  ;;  %v1749_v25 = vcombine.high %v592_v20, %v596_v21 }
  0xa5   : > { %1333 = vmatmul.mubr.bf16.vlgmr.msra.gmra.mxu0 %v1682_v30  ;;  %v1746_v30 = vcombine.low %v591_v18, %v595_v19 }
  0xa6   : > { %1453 = vmatmul.mubr.bf16.vlgmr.msra.gmra.mxu1 %v1684_v31  ;;  %1340 = vmatprep.mubr.bf16.mxu0 %v1691_v32  ;;  %v1748_v31 = vcombine.low %v592_v20, %v596_v21  ;;  %v1755_v32 = vcombine.high %v599_v26, %v603_v27 }
  0xa7   : > { %1767 = vmatprep.mubr.msk.bf16.mxu1 %vm1026_vm0, %v1693_v33  ;;  %v1757_v33 = vcombine.high %v600_v28, %v604_v29 }
  0xad   : > { %1341 = vmatmul.mubr.bf16.gmra.mxu0 %v1690_v38  ;;  %v1763_v38 = vcombine.high %v607_v34, %v607_v34 }
  0xae   : > { %1461 = vmatmul.mubr.bf16.gmra.mxu1 %v1692_v39  ;;  %1348 = vmatprep.mubr.bf16.mxu0 %v1699_v40  ;;  %v1765_v39 = vcombine.high %v608_v35, %v608_v35  ;;  %v1762_v40 = vcombine.low %v607_v34, %v607_v34 }
  0xaf   : > { %1768 = vmatprep.mubr.msk.bf16.mxu1 %vm1026_vm0, %v1701_v41  ;;  %v1764_v41 = vcombine.low %v608_v35, %v608_v35 }
  0xb5   : > { %1349 = vmatmul.mubr.bf16.gmra.mxu0 %v1698_v46 }
  0xb6   : > { %1469 = vmatmul.mubr.bf16.gmra.mxu1 %v1700_v47  ;;  %1356 = vmatprep.mubr.bf16.mxu0 %v1707_v48 }
  0xb7   : > { %1769 = vmatprep.mubr.msk.bf16.mxu1 %vm1026_vm0, %v1709_v49 }
  0xbd   : > { %1357 = vmatmul.mubr.bf16.gmra.mxu0 %v1706_v54 }
  0xbe   : > { %1477 = vmatmul.mubr.bf16.gmra.mxu1 %v1708_v55  ;;  %1364 = vmatprep.mubr.bf16.mxu0 %v1715_v56 }
  0xbf   : > { %1770 = vmatprep.mubr.msk.bf16.mxu1 %vm1026_vm0, %v1717_v57 }
  0xc5   : > { %1365 = vmatmul.mubr.bf16.gmra.mxu0 %v1714_v62 }
  0xc6   : > { %1485 = vmatmul.mubr.bf16.gmra.mxu1 %v1716_v63  ;;  %1372 = vmatprep.mubr.bf16.mxu0 %v1723_v0 }
  0xc7   : > { %1771 = vmatprep.mubr.msk.bf16.mxu1 %vm1026_vm0, %v1725_v1 }
  0xcd   : > { %1373 = vmatmul.mubr.bf16.gmra.mxu0 %v1722_v6 }
  0xce   : > { %1493 = vmatmul.mubr.bf16.gmra.mxu1 %v1724_v7  ;;  %1380 = vmatprep.mubr.bf16.mxu0 %v1731_v8 }
  0xcf   : > { %1772 = vmatprep.mubr.msk.bf16.mxu1 %vm1026_vm0, %v1733_v9 }
  0xd5   : > { %1381 = vmatmul.mubr.bf16.gmra.mxu0 %v1730_v14 }
  0xd6   : > { %1501 = vmatmul.mubr.bf16.gmra.mxu1 %v1732_v15  ;;  %1388 = vmatprep.mubr.bf16.mxu0 %v1739_v16 }
  0xd7   : > { %1773 = vmatprep.mubr.msk.bf16.mxu1 %vm1026_vm0, %v1741_v17 }
  0xdd   : > { %1389 = vmatmul.mubr.bf16.gmra.mxu0 %v1738_v22 }
  0xde   : > { %1509 = vmatmul.mubr.bf16.gmra.mxu1 %v1740_v23  ;;  %1396 = vmatprep.mubr.bf16.mxu0 %v1747_v24 }
  0xdf   : > { %1774 = vmatprep.mubr.msk.bf16.mxu1 %vm1026_vm0, %v1749_v25 }
  0xe5   : > { %1397 = vmatmul.mubr.bf16.gmra.mxu0 %v1746_v30 }
  0xe6   : > { %1517 = vmatmul.mubr.bf16.gmra.mxu1 %v1748_v31  ;;  %1404 = vmatprep.mubr.bf16.mxu0 %v1755_v32 }
  0xe7   : > { %1775 = vmatprep.mubr.msk.bf16.mxu1 %vm1026_vm0, %v1757_v33 }
  0xed   : > { %1405 = vmatmul.mubr.bf16.gmra.mxu0 %v1754_v36 }
  0xee   : > { %1525 = vmatmul.mubr.bf16.gmra.mxu1 %v1756_v37  ;;  %1412 = vmatprep.mubr.bf16.mxu0 %v1763_v38 }
  0xef   : > { %1776 = vmatprep.mubr.msk.bf16.mxu1 %vm1026_vm0, %v1765_v39 }
  0xf5   : > { %1413 = vmatmul.mubr.bf16.gmra.mxu0 %v1762_v40 }
  0xf6   : > { %1533 = vmatmul.mubr.bf16.gmra.mxu1 %v1764_v41 }
 0x10d   : > { %v1798_v42 = vpop.f32.mrf.mxu0 }
 0x10e   : > { %v1880_v43 = vpop.f32.mrf.mxu1 }
 0x10f   : > { %v1799_v44 = vpop.f32.mrf.mxu0 }
 0x110   : > { %v1800_v45 = vadd.f32 %v1799_v44, %v1798_v42  ;;  %v1881_v46 = vpop.f32.mrf.mxu1 }
 0x111   : > { %v1882_v47 = vadd.f32 %v1881_v46, %v1880_v43  ;;  %v1801_v48 = vpop.f32.mrf.mxu0 }
 0x112   : > { %v1883_v49 = vpop.f32.mrf.mxu1 }
 0x113   : > { %v2828_v50 = vadd.f32 %v1882_v47, %v1800_v45  ;;  %v1802_v51 = vpop.f32.mrf.mxu0 }
 0x114   : > { %v1803_v52 = vadd.f32 %v1802_v51, %v1801_v48  ;;  %v1884_v53 = vpop.f32.mrf.mxu1 }
 0x115   : > { %v1885_v54 = vadd.f32 %v1884_v53, %v1883_v49  ;;  %v1804_v55 = vpop.f32.mrf.mxu0 }
 0x116   : > { %v1886_v56 = vpop.f32.mrf.mxu1 }
 0x117   : > { %v2830_v57 = vadd.f32 %v1885_v54, %v1803_v52  ;;  %v1805_v58 = vpop.f32.mrf.mxu0 }
 0x118   : > { %v1806_v59 = vadd.f32 %v1805_v58, %v1804_v55  ;;  %v1887_v60 = vpop.f32.mrf.mxu1 }
 0x119   : > { %v1888_v61 = vadd.f32 %v1887_v60, %v1886_v56  ;;  %v1807_v62 = vpop.f32.mrf.mxu0 }
 0x11a   : > { %v1889_v63 = vpop.f32.mrf.mxu1 }
 0x11b   : > { %v2832_v0 = vadd.f32 %v1888_v61, %v1806_v59  ;;  %v1808_v1 = vpop.f32.mrf.mxu0 }
 0x11c   : > { %v1809_v2 = vadd.f32 %v1808_v1, %v1807_v62  ;;  %v1890_v3 = vpop.f32.mrf.mxu1 }
 0x11d   : > { %v1891_v4 = vadd.f32 %v1890_v3, %v1889_v63  ;;  %v1810_v5 = vpop.f32.mrf.mxu0 }
 0x11e   : > { %v1892_v6 = vpop.f32.mrf.mxu1 }
 0x11f   : > { %v2834_v7 = vadd.f32 %v1891_v4, %v1809_v2  ;;  %v1811_v8 = vpop.f32.mrf.mxu0 }
 0x120   : > { %v1812_v9 = vadd.f32 %v1811_v8, %v1810_v5  ;;  %v1893_v10 = vpop.f32.mrf.mxu1 }
 0x121   : > { %v1894_v11 = vadd.f32 %v1893_v10, %v1892_v6  ;;  %v1813_v12 = vpop.f32.mrf.mxu0 }
 0x122   : > { %v1895_v13 = vpop.f32.mrf.mxu1 }
 0x123   : > { %v2836_v14 = vadd.f32 %v1894_v11, %v1812_v9  ;;  %v1814_v15 = vpop.f32.mrf.mxu0 }
 0x124   : > { %v1815_v16 = vadd.f32 %v1814_v15, %v1813_v12  ;;  %v1896_v17 = vpop.f32.mrf.mxu1 }
 0x125   : > { %v1897_v18 = vadd.f32 %v1896_v17, %v1895_v13  ;;  %v1816_v19 = vpop.f32.mrf.mxu0 }
 0x126   : > { %v1898_v20 = vpop.f32.mrf.mxu1 }
 0x127   : > { %v2838_v21 = vadd.f32 %v1897_v18, %v1815_v16  ;;  %v1817_v22 = vpop.f32.mrf.mxu0 }
 0x128   : > { %v1818_v23 = vadd.f32 %v1817_v22, %v1816_v19  ;;  %v1899_v24 = vpop.f32.mrf.mxu1 }
 0x129   : > { %v1900_v25 = vadd.f32 %v1899_v24, %v1898_v20  ;;  %v1819_v26 = vpop.f32.mrf.mxu0 }
 0x12a   : > { %v1901_v27 = vpop.f32.mrf.mxu1 }
 0x12b   : > { %v2840_v28 = vadd.f32 %v1900_v25, %v1818_v23  ;;  %v1820_v29 = vpop.f32.mrf.mxu0 }
 0x12c   : > { %v1821_v30 = vadd.f32 %v1820_v29, %v1819_v26  ;;  %v1902_v31 = vpop.f32.mrf.mxu1 }
 0x12d   : > { %v1903_v32 = vadd.f32 %v1902_v31, %v1901_v27  ;;  %v1822_v33 = vpop.f32.mrf.mxu0 }
 0x12e   : > { %v1904_v34 = vpop.f32.mrf.mxu1 }
 0x12f   : > { %v2842_v35 = vadd.f32 %v1903_v32, %v1821_v30  ;;  %v1823_v36 = vpop.f32.mrf.mxu0 }
 0x130   : > { %v1824_v37 = vadd.f32 %v1823_v36, %v1822_v33  ;;  %v1905_v38 = vpop.f32.mrf.mxu1 }
 0x131   : > { %v1906_v39 = vadd.f32 %v1905_v38, %v1904_v34  ;;  %v1825_v40 = vpop.f32.mrf.mxu0 }
 0x132   : > { %v1907_v41 = vpop.f32.mrf.mxu1 }
 0x133   : > { %v2844_v42 = vadd.f32 %v1906_v39, %v1824_v37  ;;  %v1826_v43 = vpop.f32.mrf.mxu0 }
 0x134   : > { %v1827_v44 = vadd.f32 %v1826_v43, %v1825_v40  ;;  %v1908_v45 = vpop.f32.mrf.mxu1 }
 0x135   : > { %v1909_v46 = vadd.f32 %v1908_v45, %v1907_v41  ;;  %v1828_v47 = vpop.f32.mrf.mxu0 }
 0x136   : > { %v1910_v48 = vpop.f32.mrf.mxu1 }
 0x137   : > { %v2846_v49 = vadd.f32 %v1909_v46, %v1827_v44  ;;  %v1829_v51 = vpop.f32.mrf.mxu0 }
 0x138   : > { %v1830_v52 = vadd.f32 %v1829_v51, %v1828_v47  ;;  %v1911_v53 = vpop.f32.mrf.mxu1 }
 0x139   : > { %v1912_v54 = vadd.f32 %v1911_v53, %v1910_v48  ;;  %v1831_v55 = vpop.f32.mrf.mxu0 }
 0x13a   : > { %v1913_v56 = vpop.f32.mrf.mxu1 }
 0x13b   : > { %v2848_v58 = vadd.f32 %v1912_v54, %v1830_v52  ;;  %v1832_v59 = vpop.f32.mrf.mxu0 }
 0x13c   : > { %v1833_v60 = vadd.f32 %v1832_v59, %v1831_v55  ;;  %v1914_v61 = vpop.f32.mrf.mxu1 }
 0x13d   : > { %v1915_v62 = vadd.f32 %v1914_v61, %v1913_v56  ;;  %v1834_v63 = vpop.f32.mrf.mxu0 }
 0x13e   : > { %v1916_v1 = vpop.f32.mrf.mxu1 }
 0x13f   : > { %v2850_v2 = vadd.f32 %v1915_v62, %v1833_v60  ;;  %v1835_v3 = vpop.f32.mrf.mxu0 }
 0x140   : > { %v1836_v4 = vadd.f32 %v1835_v3, %v1834_v63  ;;  %v1917_v5 = vpop.f32.mrf.mxu1 }
 0x141   : > { %v1918_v6 = vadd.f32 %v1917_v5, %v1916_v1  ;;  %v1837_v8 = vpop.f32.mrf.mxu0 }
 0x142   : > { %v1919_v9 = vpop.f32.mrf.mxu1 }
 0x143   : > { %v2852_v10 = vadd.f32 %v1918_v6, %v1836_v4  ;;  %v1838_v11 = vpop.f32.mrf.mxu0 }
 0x144   : > { %v1839_v12 = vadd.f32 %v1838_v11, %v1837_v8  ;;  %v1920_v13 = vpop.f32.mrf.mxu1 }
 0x145   : > { %v1921_v15 = vadd.f32 %v1920_v13, %v1919_v9  ;;  %v1840_v16 = vpop.f32.mrf.mxu0 }
 0x146   : > { %v1922_v17 = vpop.f32.mrf.mxu1 }
 0x147   : > { %v2854_v18 = vadd.f32 %v1921_v15, %v1839_v12  ;;  %v1841_v19 = vpop.f32.mrf.mxu0 }
 0x148   : > { %v1842_v20 = vadd.f32 %v1841_v19, %v1840_v16  ;;  %v1923_v22 = vpop.f32.mrf.mxu1 }
 0x149   : > { %v1924_v23 = vadd.f32 %v1923_v22, %v1922_v17  ;;  %v1843_v24 = vpop.f32.mrf.mxu0 }
 0x14a   : > { %v1925_v25 = vpop.f32.mrf.mxu1 }
 0x14b   : > { %v2856_v26 = vadd.f32 %v1924_v23, %v1842_v20  ;;  %v1844_v27 = vpop.f32.mrf.mxu0 }
 0x14c   : > { %v1845_v29 = vadd.f32 %v1844_v27, %v1843_v24  ;;  %v1926_v30 = vpop.f32.mrf.mxu1 }
 0x14d   : > { %v1927_v31 = vadd.f32 %v1926_v30, %v1925_v25  ;;  %v1846_v32 = vpop.f32.mrf.mxu0 }
 0x14e   : > { %v1928_v33 = vpop.f32.mrf.mxu1 }
 0x14f   : > { %v2858_v34 = vadd.f32 %v1927_v31, %v1845_v29  ;;  %v1847_v36 = vpop.f32.mrf.mxu0 }
 0x150   : > { %v1848_v37 = vadd.f32 %v1847_v36, %v1846_v32  ;;  %v1929_v38 = vpop.f32.mrf.mxu1 }
 0x151   : > { %v1930_v39 = vadd.f32 %v1929_v38, %v1928_v33  ;;  %v1849_v40 = vpop.f32.mrf.mxu0 }
 0x152   : > { %v1931_v41 = vpop.f32.mrf.mxu1 }
 0x153   : > { %v2860_v43 = vadd.f32 %v1930_v39, %v1848_v37  ;;  %v1850_v44 = vpop.f32.mrf.mxu0 }
 0x154   : > { %v1851_v45 = vadd.f32 %v1850_v44, %v1849_v40  ;;  %v1932_v46 = vpop.f32.mrf.mxu1 }
 0x155   : > { %v1933_v47 = vadd.f32 %v1932_v46, %v1931_v41  ;;  %v1852_v48 = vpop.f32.mrf.mxu0 }
 0x156   : > { %v1934_v51 = vpop.f32.mrf.mxu1 }
 0x157   : > { %v2862_v52 = vadd.f32 %v1933_v47, %v1851_v45  ;;  %v1853_v53 = vpop.f32.mrf.mxu0 }
 0x158   : > { %v1854_v54 = vadd.f32 %v1853_v53, %v1852_v48  ;;  %v1935_v55 = vpop.f32.mrf.mxu1 }
 0x159   : > { %v1936_v56 = vadd.f32 %v1935_v55, %v1934_v51  ;;  %v1855_v59 = vpop.f32.mrf.mxu0 }
 0x15a   : > { %v1937_v60 = vpop.f32.mrf.mxu1 }
 0x15b   : > { %v2864_v61 = vadd.f32 %v1936_v56, %v1854_v54  ;;  %v1856_v62 = vpop.f32.mrf.mxu0 }
 0x15c   : > { %v1857_v63 = vadd.f32 %v1856_v62, %v1855_v59  ;;  %v1938_v1 = vpop.f32.mrf.mxu1 }
 0x15d   : > { %v1939_v3 = vadd.f32 %v1938_v1, %v1937_v60  ;;  %v1858_v4 = vpop.f32.mrf.mxu0 }
 0x15e   : > { %v1940_v5 = vpop.f32.mrf.mxu1 }
 0x15f   : > { %v2867_v6 = vadd.f32 %v1939_v3, %v1857_v63  ;;  %v1859_v8 = vpop.f32.mrf.mxu0 }
 0x160   : > { %v1860_v9 = vadd.f32 %v1859_v8, %v1858_v4  ;;  %v1941_v11 = vpop.f32.mrf.mxu1 }
 0x161   : > { %v1942_v12 = vadd.f32 %v1941_v11, %v1940_v5  ;;  %v1861_v13 = vpop.f32.mrf.mxu0 }
 0x162   : > { %v1943_v15 = vpop.f32.mrf.mxu1 }
 0x163   : > { %v2869_v16 = vadd.f32 %v1942_v12, %v1860_v9  ;;  %v1862_v17 = vpop.f32.mrf.mxu0 }
 0x164   : > { %v1944_v19 = vpop.f32.mrf.mxu1 }
 0x165   : > { %v1962_v20 = vpop.f32.mrf.mxu0 }
 0x166   : > { %v1454_v22 = vpop.f32.mrf.mxu1 }
 0x167   : > { %v1963_v23 = vpop.f32.mrf.mxu0 }
 0x168   : > { %v1964_v24 = vadd.f32 %v1963_v23, %v1962_v20  ;;  %v1456_v25 = vpop.f32.mrf.mxu1 }
 0x169   : > { %v1965_v27 = vpop.f32.mrf.mxu0 }
 0x16a   : > { %v1335_v29 = vadd.f32 %v1964_v24, %v2828_v50  ;;  %v1457_v30 = vpop.f32.mrf.mxu1 }
 0x16b   : > { %v1966_v31 = vpop.f32.mrf.mxu0 }
 0x16c   : > { %v1455_v32 = vadd.f32 %v1454_v22, %v1335_v29  ;;  %v1967_v33 = vadd.f32 %v1966_v31, %v1965_v27  ;;  %v1459_v36 = vpop.f32.mrf.mxu1 }
 0x16d   : > { %v1968_v37 = vpop.f32.mrf.mxu0 }
 0x16e   : > { %1541 = vst.msk [vmem:[%s2875_s6] sm:$0xff] %vm1540_vm1, %v1455_v32  ;;  %v1338_v38 = vadd.f32 %v1967_v33, %v2830_v57  ;;  %v1462_v50 = vpop.f32.mrf.mxu1 }
 0x16f   : > { %v1969_v39 = vpop.f32.mrf.mxu0 }
 0x170   : > { %v1458_v40 = vadd.f32 %v1457_v30, %v1338_v38  ;;  %v1970_v41 = vadd.f32 %v1969_v39, %v1968_v37  ;;  %v1464_v44 = vpop.f32.mrf.mxu1 }
 0x171   : > { %v1971_v45 = vpop.f32.mrf.mxu0 }
 0x172   : > { %1542 = vst.msk [vmem:[%s2875_s6 + $0x8] sm:$0xff] %vm1540_vm1, %v1458_v40  ;;  %v1343_v46 = vadd.f32 %v1970_v41, %v2832_v0  ;;  %v1465_v47 = vpop.f32.mrf.mxu1 }
 0x173   : > { %v1972_v48 = vpop.f32.mrf.mxu0 }
 0x174   : > { %v1463_v51 = vadd.f32 %v1462_v50, %v1343_v46  ;;  %v1973_v53 = vadd.f32 %v1972_v48, %v1971_v45  ;;  %v1467_v54 = vpop.f32.mrf.mxu1 }
 0x175   : > { %v1974_v55 = vpop.f32.mrf.mxu0 }
 0x176   : > { %1543 = vst.msk [vmem:[%s2875_s6 + $0x10] sm:$0xff] %vm1540_vm1, %v1463_v51  ;;  %v1346_v57 = vadd.f32 %v1973_v53, %v2834_v7  ;;  %v1470_v56 = vpop.f32.mrf.mxu1 }
 0x177   : > { %v1975_v59 = vpop.f32.mrf.mxu0 }
 0x178   : > { %v1466_v60 = vadd.f32 %v1465_v47, %v1346_v57  ;;  %v1976_v62 = vadd.f32 %v1975_v59, %v1974_v55  ;;  %v1472_v63 = vpop.f32.mrf.mxu1 }
 0x179   : > { %v1977_v1 = vpop.f32.mrf.mxu0 }
 0x17a   : > { %1544 = vst.msk [vmem:[%s2875_s6 + $0x18] sm:$0xff] %vm1540_vm1, %v1466_v60  ;;  %v1351_v0 = vadd.f32 %v1976_v62, %v2836_v14  ;;  %v1473_v3 = vpop.f32.mrf.mxu1 }
 0x17b   : > { %v1978_v4 = vpop.f32.mrf.mxu0 }
 0x17c   : > { %v1471_v5 = vadd.f32 %v1470_v56, %v1351_v0  ;;  %v1979_v8 = vadd.f32 %v1978_v4, %v1977_v1  ;;  %v1475_v9 = vpop.f32.mrf.mxu1 }
 0x17d   : > { %v1980_v11 = vpop.f32.mrf.mxu0 }
 0x17e   : > { %1545 = vst.msk [vmem:[%s2875_s6 + $0x20] sm:$0xff] %vm1540_vm1, %v1471_v5  ;;  %v1354_v7 = vadd.f32 %v1979_v8, %v2838_v21  ;;  %v1478_v12 = vpop.f32.mrf.mxu1 }
 0x17f   : > { %v1981_v13 = vpop.f32.mrf.mxu0 }
 0x180   : > { %v1474_v15 = vadd.f32 %v1473_v3, %v1354_v7  ;;  %v1982_v17 = vadd.f32 %v1981_v13, %v1980_v11  ;;  %v1480_v19 = vpop.f32.mrf.mxu1 }
 0x181   : > { %v1983_v20 = vpop.f32.mrf.mxu0 }
 0x182   : > { %1546 = vst.msk [vmem:[%s2875_s6 + $0x28] sm:$0xff] %vm1540_vm1, %v1474_v15  ;;  %v1359_v14 = vadd.f32 %v1982_v17, %v2840_v28  ;;  %v1481_v22 = vpop.f32.mrf.mxu1 }
 0x183   : > { %v1984_v23 = vpop.f32.mrf.mxu0 }
 0x184   : > { %v1479_v24 = vadd.f32 %v1478_v12, %v1359_v14  ;;  %v1985_v25 = vadd.f32 %v1984_v23, %v1983_v20  ;;  %v1483_v27 = vpop.f32.mrf.mxu1 }
 0x185   : > { %v1986_v29 = vpop.f32.mrf.mxu0 }
 0x186   : > { %1547 = vst.msk [vmem:[%s2875_s6 + $0x30] sm:$0xff] %vm1540_vm1, %v1479_v24  ;;  %v1362_v21 = vadd.f32 %v1985_v25, %v2842_v35  ;;  %v1486_v30 = vpop.f32.mrf.mxu1 }
 0x187   : > { %v1987_v31 = vpop.f32.mrf.mxu0 }
 0x188   : > { %v1482_v32 = vadd.f32 %v1481_v22, %v1362_v21  ;;  %v1988_v33 = vadd.f32 %v1987_v31, %v1986_v29  ;;  %v1488_v36 = vpop.f32.mrf.mxu1 }
 0x189   : > { %v1989_v37 = vpop.f32.mrf.mxu0 }
 0x18a   : > { %1548 = vst.msk [vmem:[%s2875_s6 + $0x38] sm:$0xff] %vm1540_vm1, %v1482_v32  ;;  %v1367_v28 = vadd.f32 %v1988_v33, %v2844_v42  ;;  %v1489_v38 = vpop.f32.mrf.mxu1 }
 0x18b   : > { %v1990_v50 = vpop.f32.mrf.mxu0 }
 0x18c   : > { %v1487_v39 = vadd.f32 %v1486_v30, %v1367_v28  ;;  %v1991_v40 = vadd.f32 %v1990_v50, %v1989_v37  ;;  %v1491_v41 = vpop.f32.mrf.mxu1 }
 0x18d   : > { %v1992_v44 = vpop.f32.mrf.mxu0 }
 0x18e   : > { %1549 = vst.msk [vmem:[%s2875_s6 + $0x40] sm:$0xff] %vm1540_vm1, %v1487_v39  ;;  %v1370_v35 = vadd.f32 %v1991_v40, %v2846_v49  ;;  %v1494_v45 = vpop.f32.mrf.mxu1 }
 0x18f   : > { %v1993_v46 = vpop.f32.mrf.mxu0 }
 0x190   : > { %v1490_v47 = vadd.f32 %v1489_v38, %v1370_v35  ;;  %v1994_v48 = vadd.f32 %v1993_v46, %v1992_v44  ;;  %v1496_v51 = vpop.f32.mrf.mxu1 }
 0x191   : > { %v1995_v53 = vpop.f32.mrf.mxu0 }
 0x192   : > { %1550 = vst.msk [vmem:[%s2875_s6 + $0x48] sm:$0xff] %vm1540_vm1, %v1490_v47  ;;  %v1375_v42 = vadd.f32 %v1994_v48, %v2848_v58  ;;  %v1497_v54 = vpop.f32.mrf.mxu1 }
 0x193   : > { %v1996_v55 = vpop.f32.mrf.mxu0 }
 0x194   : > { %v1495_v57 = vadd.f32 %v1494_v45, %v1375_v42  ;;  %v1997_v56 = vadd.f32 %v1996_v55, %v1995_v53  ;;  %v1499_v59 = vpop.f32.mrf.mxu1 }
 0x195   : > { %v1998_v60 = vpop.f32.mrf.mxu0 }
 0x196   : > { %1551 = vst.msk [vmem:[%s2875_s6 + $0x50] sm:$0xff] %vm1540_vm1, %v1495_v57  ;;  %v1378_v49 = vadd.f32 %v1997_v56, %v2850_v2  ;;  %v1502_v62 = vpop.f32.mrf.mxu1 }
 0x197   : > { %v1999_v63 = vpop.f32.mrf.mxu0 }
 0x198   : > { %v1498_v1 = vadd.f32 %v1497_v54, %v1378_v49  ;;  %v2000_v0 = vadd.f32 %v1999_v63, %v1998_v60  ;;  %v1504_v3 = vpop.f32.mrf.mxu1 }
 0x199   : > { %v2001_v4 = vpop.f32.mrf.mxu0 }
 0x19a   : > { %1552 = vst.msk [vmem:[%s2875_s6 + $0x58] sm:$0xff] %vm1540_vm1, %v1498_v1  ;;  %v1383_v58 = vadd.f32 %v2000_v0, %v2852_v10  ;;  %v1505_v5 = vpop.f32.mrf.mxu1 }
 0x19b   : > { %v2002_v8 = vpop.f32.mrf.mxu0 }
 0x19c   : > { %v1503_v9 = vadd.f32 %v1502_v62, %v1383_v58  ;;  %v2003_v11 = vadd.f32 %v2002_v8, %v2001_v4  ;;  %v1507_v7 = vpop.f32.mrf.mxu1 }
 0x19d   : > { %v2004_v12 = vpop.f32.mrf.mxu0 }
 0x19e   : > { %1553 = vst.msk [vmem:[%s2875_s6 + $0x60] sm:$0xff] %vm1540_vm1, %v1503_v9  ;;  %v1386_v2 = vadd.f32 %v2003_v11, %v2854_v18  ;;  %v1510_v13 = vpop.f32.mrf.mxu1 }
 0x19f   : > { %v2005_v15 = vpop.f32.mrf.mxu0 }
 0x1a0   : > { %v1506_v17 = vadd.f32 %v1505_v5, %v1386_v2  ;;  %v2006_v19 = vadd.f32 %v2005_v15, %v2004_v12  ;;  %v1512_v20 = vpop.f32.mrf.mxu1 }
 0x1a1   : > { %v2007_v14 = vpop.f32.mrf.mxu0 }
 0x1a2   : > { %1554 = vst.msk [vmem:[%s2875_s6 + $0x68] sm:$0xff] %vm1540_vm1, %v1506_v17  ;;  %v1391_v10 = vadd.f32 %v2006_v19, %v2856_v26  ;;  %v1513_v22 = vpop.f32.mrf.mxu1 }
 0x1a3   : > { %v2008_v23 = vpop.f32.mrf.mxu0 }
 0x1a4   : > { %v1511_v24 = vadd.f32 %v1510_v13, %v1391_v10  ;;  %v2009_v25 = vadd.f32 %v2008_v23, %v2007_v14  ;;  %v1515_v27 = vpop.f32.mrf.mxu1 }
 0x1a5   : > { %v2010_v29 = vpop.f32.mrf.mxu0 }
 0x1a6   : > { %1555 = vst.msk [vmem:[%s2875_s6 + $0x70] sm:$0xff] %vm1540_vm1, %v1511_v24  ;;  %v1394_v18 = vadd.f32 %v2009_v25, %v2858_v34  ;;  %v1518_v21 = vpop.f32.mrf.mxu1 }
 0x1a7   : > { %v2011_v30 = vpop.f32.mrf.mxu0 }
 0x1a8   : > { %v1514_v31 = vadd.f32 %v1513_v22, %v1394_v18  ;;  %v2012_v32 = vadd.f32 %v2011_v30, %v2010_v29  ;;  %v1520_v33 = vpop.f32.mrf.mxu1 }
 0x1a9   : > { %v2013_v36 = vpop.f32.mrf.mxu0 }
 0x1aa   : > { %1556 = vst.msk [vmem:[%s2875_s6 + $0x78] sm:$0xff] %vm1540_vm1, %v1514_v31  ;;  %v1399_v26 = vadd.f32 %v2012_v32, %v2860_v43  ;;  %v1521_v37 = vpop.f32.mrf.mxu1 }
 0x1ab   : > { %v2014_v28 = vpop.f32.mrf.mxu0 }
 0x1ac   : > { %v1519_v38 = vadd.f32 %v1518_v21, %v1399_v26  ;;  %v2015_v50 = vadd.f32 %v2014_v28, %v2013_v36  ;;  %v1523_v39 = vpop.f32.mrf.mxu1 }
 0x1ad   : > { %v2016_v40 = vpop.f32.mrf.mxu0 }
 0x1ae   : > { %1557 = vst.msk [vmem:[%s2875_s6 + $0x80] sm:$0xff] %vm1540_vm1, %v1519_v38  ;;  %v1402_v34 = vadd.f32 %v2015_v50, %v2862_v52  ;;  %v1526_v41 = vpop.f32.mrf.mxu1 }
 0x1af   : > { %v2017_v44 = vpop.f32.mrf.mxu0 }
 0x1b0   : > { %v1522_v35 = vadd.f32 %v1521_v37, %v1402_v34  ;;  %v2018_v45 = vadd.f32 %v2017_v44, %v2016_v40  ;;  %v1528_v46 = vpop.f32.mrf.mxu1 }
 0x1b1   : > { %v2019_v47 = vpop.f32.mrf.mxu0 }
 0x1b2   : > { %1558 = vst.msk [vmem:[%s2875_s6 + $0x88] sm:$0xff] %vm1540_vm1, %v1522_v35  ;;  %v1407_v43 = vadd.f32 %v2018_v45, %v2864_v61  ;;  %v1529_v48 = vpop.f32.mrf.mxu1 }
 0x1b3   : > { %v2020_v51 = vpop.f32.mrf.mxu0 }
 0x1b4   : > { %v1527_v53 = vadd.f32 %v1526_v41, %v1407_v43  ;;  %v2021_v42 = vadd.f32 %v2020_v51, %v2019_v47  ;;  %v1531_v54 = vpop.f32.mrf.mxu1 }
 0x1b5   : > { %v2022_v55 = vpop.f32.mrf.mxu0 }
 0x1b6   : > { %1559 = vst.msk [vmem:[%s2875_s6 + $0x90] sm:$0xff] %vm1540_vm1, %v1527_v53  ;;  %v1410_v52 = vadd.f32 %v2021_v42, %v2867_v6  ;;  %v1534_v57 = vpop.f32.mrf.mxu1 }
 0x1b7   : > { %v2023_v56 = vpop.f32.mrf.mxu0 }
 0x1b8   : > { %v1530_v59 = vadd.f32 %v1529_v48, %v1410_v52  ;;  %v2024_v60 = vadd.f32 %v2023_v56, %v2022_v55  ;;  %v1536_v49 = vpop.f32.mrf.mxu1 }
 0x1b9   : > { %v2025_v62 = vpop.f32.mrf.mxu0 }
 0x1ba   : > { %1560 = vst.msk [vmem:[%s2875_s6 + $0x98] sm:$0xff] %vm1540_vm1, %v1530_v59  ;;  %v1415_v61 = vadd.f32 %v2024_v60, %v2869_v16  ;;  %v1537_v63 = vpop.f32.mrf.mxu1 }
 0x1bb   : > { %v2026_v1 = vpop.f32.mrf.mxu0 }
 0x1bc   : > { %v1535_v0 = vadd.f32 %v1534_v57, %v1415_v61  ;;  %v1538_v3 = vpop.f32.mrf.mxu1 }
 0x1be   : > { %1561 = vst.msk [vmem:[%s2875_s6 + $0xa0] sm:$0xff] %vm1540_vm1, %v1535_v0 }
 0x1bf PF: > { %s15_s14 = sadd.s32 1, %s2174_s14   ;;  %s2962_s9 = smov %s2158_s10 }
 0x1c0   : > { %p12_p8 = scmp.ge.s32.totalorder %s15_s14, 8   ;;  %s2963_s10 = smov %s2162_s11 }
 0x1c1   : > { %s2964_s11 = smov %s2240_s20  ;;  %s2965_s12 = smov %s2170_s13 }
 0x1c2   : > { %s2966_s13 = smov %s2968_s16  ;;  %14 = sbr.rel (!%p12_p8) target bundleno = 4 (0x4), region = 71 }
 0x1c7   :  { %1592 = vsyncpa [#allocation3], 1 }
 0x1c8   :  { %1594 = vsyncpa [#allocation3 + $0x1], 1 }

</bundles_post_ra>
